<compile_context>
chip_gen: v6e
topology: v6e:2x2x1
jax: 0.10.0
libtpu: 0.0.40
codegen_flags: <defaults>
</compile_context>

<pallas_src>
import functools

import jax
import jax.numpy as jnp
from jax import lax
from jax.experimental import pallas as pl
from jax.experimental.pallas import tpu as pltpu


def _huber_kernel(pred_ref, target_ref, out_ref, *, delta, m_rows, tile_m,
                  needs_mask):
    j = pl.program_id(1)

    @pl.when(j == 0)
    def _():
        out_ref[...] = jnp.zeros_like(out_ref)

    diff = pred_ref[...].astype(jnp.float32) - target_ref[...].astype(jnp.float32)

    if needs_mask:
        # The last row step may extend past M; zero those rows (zero diff ->
        # zero loss), which also discards any out-of-bounds pad garbage.
        rows = lax.broadcasted_iota(jnp.int32, diff.shape, 0) + j * tile_m
        diff = jnp.where(rows < m_rows, diff, jnp.float32(0.0))

    abs_diff = jnp.abs(diff)
    d = jnp.float32(delta)
    quadratic = jnp.minimum(abs_diff, d)
    linear = abs_diff - quadratic
    # 2x the Huber loss; the 0.5 is folded into the wrapper-side scale.
    loss2 = quadratic * quadratic + jnp.float32(2.0 * delta) * linear

    tm, tn = loss2.shape
    # Fold rows into a vreg-aligned (8, tile_n) slab and accumulate.
    out_ref[...] += loss2.reshape(tm // 8, 8, tn).sum(axis=0)


# Conservative cross-generation VMEM numbers: v7x has 64 MiB physical VMEM
# (32 MiB scoped default); v5e/v6e have 128 MiB physical (16/32 MiB default).
_BLOCK_VMEM_BUDGET = 32 * 1024 * 1024   # budget used to size pipeline blocks
_VMEM_LIMIT_CAP = 40 * 1024 * 1024      # explicit scoped-VMEM cap we request


def huber_loss(pred, target, delta=1.0, *, target_block_bytes=None):
    assert pred.shape == target.shape, "pred/target shapes must match"
    assert pred.ndim == 2, "wrapper expects 2-D [M, N] inputs"
    assert pred.dtype == target.dtype, "pred/target dtypes must match"
    M, N = pred.shape
    itemsize = jnp.dtype(pred.dtype).itemsize
    # sublane packing grain: 8 rows for 32-bit, 16 for 16-bit, 32 for 8-bit
    grain = max(8, 32 // itemsize)
    assert N % 128 == 0, "last dim must be a multiple of 128 (lane axis)"
    # TODO(synk): ragged N would additionally need a lane mask; rejected here.

    # ---- block sizing ----------------------------------------------------
    out_bytes = 8 * N * 4
    # 2 inputs x 2 pipeline buffers (native dtype) + ~3 block-sized f32 temps.
    per_elem_bytes = 4 * itemsize + 3 * 4
    slack = 2 * 1024 * 1024 + 2 * out_bytes
    max_block_elems = max(grain * 128,
                          (_BLOCK_VMEM_BUDGET - slack) // per_elem_bytes)
    if target_block_bytes is not None:
        max_block_elems = min(max_block_elems,
                              max(grain * 128, target_block_bytes // itemsize))

    # tile_n: full N when a grain-row block fits the budget, otherwise the
    # largest 128-multiple divisor of N that does (stays lane-dense).
    if grain * N <= max_block_elems:
        tile_n = N
    else:
        n_units = N // 128
        max_units = max(1, max_block_elems // (grain * 128))
        best = 1
        for cand in range(1, n_units + 1):
            if n_units % cand == 0 and cand <= max_units:
                best = cand
        tile_n = 128 * best

    # tile_m: as many rows as fit the budget (multiple of the packing grain).
    # The last row step may be ragged and is masked inside the kernel, so no
    # divisor search that could degenerate to tiny tiles.
    max_rows = max(grain, (max_block_elems // tile_n) // grain * grain)
    m_padded = ((M + grain - 1) // grain) * grain
    tile_m = min(max_rows, m_padded)
    steps = pl.cdiv(M, tile_m)
    n_blocks = N // tile_n
    needs_mask = (M % tile_m) != 0

    # ---- explicit scoped-VMEM limit sized to the real footprint ----------
    block_bytes = tile_m * tile_n * itemsize
    f32_tmp_bytes = tile_m * tile_n * 4
    vmem_need = 4 * block_bytes + 3 * f32_tmp_bytes + 2 * out_bytes + (1 << 20)
    vmem_limit = int(min(_VMEM_LIMIT_CAP, max(vmem_need, 16 * 1024 * 1024)))

    kernel = functools.partial(_huber_kernel, delta=float(delta), m_rows=M,
                               tile_m=tile_m, needs_mask=needs_mask)

    partials = pl.pallas_call(
        kernel,
        out_shape=jax.ShapeDtypeStruct((8, N), jnp.float32),
        grid_spec=pltpu.PrefetchScalarGridSpec(
            num_scalar_prefetch=0,
            grid=(n_blocks, steps),
            in_specs=[
                pl.BlockSpec((tile_m, tile_n), lambda nb, j: (j, nb)),
                pl.BlockSpec((tile_m, tile_n), lambda nb, j: (j, nb)),
            ],
            out_specs=pl.BlockSpec((8, tile_n), lambda nb, j: (0, nb)),
        ),
        compiler_params=pltpu.CompilerParams(
            # TODO(synk): pltpu.CORE_PARALLEL on the leading axis for v7x.
            dimension_semantics=("parallel", "arbitrary"),
            vmem_limit_bytes=vmem_limit,
        ),
        cost_estimate=pl.CostEstimate(
            flops=8 * M * N,
            transcendentals=0,
            bytes_accessed=2 * M * N * itemsize + out_bytes,
        ),
    )(pred, target)

    # Apply the folded 0.5 and the 1/(M*N) mean once, in f32.
    return jnp.sum(partials, dtype=jnp.float32) * jnp.float32(0.5 / (M * N))


def huber_loss_ref(pred, target, delta=1.0):
    p = pred.astype(jnp.float32)
    t = target.astype(jnp.float32)
    abs_diff = jnp.abs(p - t)
    quadratic = jnp.minimum(abs_diff, delta)
    linear = abs_diff - quadratic
    loss = 0.5 * quadratic ** 2 + delta * linear
    return jnp.mean(loss)


if __name__ == "__main__":
    key = jax.random.PRNGKey(0)
    k1, k2, k3, k4 = jax.random.split(key, 4)

    # Test 1: default (large-block) config, f32, tile-aligned shape.
    M, N = 256, 256
    pred = jax.random.normal(k1, (M, N), dtype=jnp.float32) * 2.0
    target = jax.random.normal(k2, (M, N), dtype=jnp.float32) * 2.0
    out = jax.block_until_ready(huber_loss(pred, target, delta=1.0))
    ref = huber_loss_ref(pred, target, delta=1.0)
    assert jnp.allclose(out, ref, rtol=1e-5, atol=1e-5), (out, ref)

    # Test 2: bf16 inputs; tiny block budget forces N tiling, multiple row
    # steps and a masked ragged last step (M not a multiple of tile_m).
    M2, N2 = 272, 384
    pred2 = (jax.random.normal(k3, (M2, N2), dtype=jnp.float32) * 2.0
             ).astype(jnp.bfloat16)
    target2 = (jax.random.normal(k4, (M2, N2), dtype=jnp.float32) * 2.0
               ).astype(jnp.bfloat16)
    out2 = jax.block_until_ready(
        huber_loss(pred2, target2, delta=1.0, target_block_bytes=8 * 1024))
    ref2 = huber_loss_ref(pred2, target2, delta=1.0)
    assert jnp.allclose(out2, ref2, rtol=1e-4, atol=1e-4), (out2, ref2)

    print("KERNEL_OK")
</pallas_src>

<mosaic_0001>
module attributes {stable_mosaic.version = 11 : i64} {
  func.func @_huber_kernel(%arg0: i32, %arg1: i32, %arg2: memref<256x256xf32, #tpu.memory_space<vmem>>, %arg3: memref<256x256xf32, #tpu.memory_space<vmem>>, %arg4: memref<8x256xf32, #tpu.memory_space<vmem>>) attributes {dimension_semantics = [#tpu.dimension_semantics<parallel>, #tpu.dimension_semantics<arbitrary>], iteration_bounds = array<i64: 1, 1>, scalar_prefetch = 0 : i64, scratch_operands = 0 : i64, tpu.core_type = #tpu.core_type<tc>, window_params = [{transform_indices = @transform_0, window_bounds = array<i64: 256, 256>}, {transform_indices = @transform_1, window_bounds = array<i64: 256, 256>}, {transform_indices = @transform_2, window_bounds = array<i64: 8, 256>}]} {
    %c0_i32 = arith.constant 0 : i32
    %0 = arith.cmpi eq, %arg1, %c0_i32 : i32
    %1 = arith.extui %0 : i1 to i32
    %c0_i32_0 = arith.constant 0 : i32
    %2 = arith.cmpi ne, %1, %c0_i32_0 : i32
    scf.if %2 {
      %cst_10 = arith.constant 0.000000e+00 : f32
      %19 = vector.broadcast %cst_10 : f32 to vector<8x256xf32>
      %c0_11 = arith.constant 0 : index
      %c0_12 = arith.constant 0 : index
      %20 = vector.load %arg4[%c0_11, %c0_12] : memref<8x256xf32, #tpu.memory_space<vmem>>, vector<8x256xf32>
      tpu.vector_store %arg4[%c0_11, %c0_12], %19 {strides = array<i32>} : memref<8x256xf32, #tpu.memory_space<vmem>>, vector<8x256xf32>,
    } else {
    }
    %c0 = arith.constant 0 : index
    %c0_1 = arith.constant 0 : index
    %3 = vector.load %arg2[%c0, %c0_1] : memref<256x256xf32, #tpu.memory_space<vmem>>, vector<256x256xf32>
    %c0_2 = arith.constant 0 : index
    %c0_3 = arith.constant 0 : index
    %4 = vector.load %arg3[%c0_2, %c0_3] : memref<256x256xf32, #tpu.memory_space<vmem>>, vector<256x256xf32>
    %5 = arith.subf %3, %4 : vector<256x256xf32>
    %6 = math.absf %5 : vector<256x256xf32>
    %cst = arith.constant 1.000000e+00 : f32
    %7 = vector.broadcast %cst : f32 to vector<256x256xf32>
    %8 = arith.minimumf %6, %7 : vector<256x256xf32>
    %9 = arith.subf %6, %8 : vector<256x256xf32>
    %10 = arith.mulf %8, %8 : vector<256x256xf32>
    %cst_4 = arith.constant 2.000000e+00 : f32
    %11 = vector.broadcast %cst_4 : f32 to vector<256x256xf32>
    %12 = arith.mulf %11, %9 : vector<256x256xf32>
    %13 = arith.addf %10, %12 : vector<256x256xf32>
    %c0_5 = arith.constant 0 : index
    %c0_6 = arith.constant 0 : index
    %14 = vector.load %arg4[%c0_5, %c0_6] : memref<8x256xf32, #tpu.memory_space<vmem>>, vector<8x256xf32>
    %15 = vector.shape_cast %13 : vector<256x256xf32> to vector<32x8x256xf32>
    %cst_7 = arith.constant dense<0.000000e+00> : vector<8x256xf32>
    %16 = vector.multi_reduction <add>, %15, %cst_7 [0] : vector<32x8x256xf32> to vector<8x256xf32>
    %17 = arith.addf %14, %16 : vector<8x256xf32>
    %c0_8 = arith.constant 0 : index
    %c0_9 = arith.constant 0 : index
    %18 = vector.load %arg4[%c0_8, %c0_9] : memref<8x256xf32, #tpu.memory_space<vmem>>, vector<8x256xf32>
    tpu.vector_store %arg4[%c0_8, %c0_9], %17 {strides = array<i32>} : memref<8x256xf32, #tpu.memory_space<vmem>>, vector<8x256xf32>,
    return
  }
  func.func @transform_0(%arg0: i32, %arg1: i32) -> (i32, i32) {
    %c0_i32 = arith.constant 0 : i32
    return %arg1, %arg0 : i32, i32
  }
  func.func @transform_1(%arg0: i32, %arg1: i32) -> (i32, i32) {
    %c0_i32 = arith.constant 0 : i32
    return %arg1, %arg0 : i32, i32
  }
  func.func @transform_2(%arg0: i32, %arg1: i32) -> (i32, i32) {
    %c0_i32 = arith.constant 0 : i32
    %c0_i32_0 = arith.constant 0 : i32
    return %c0_i32, %arg0 : i32, i32
  }
}

</mosaic_0001>

<bundles_post_ra>
// kernel: tpu_custom_call.1
= control target key start
LH: loop header
LB: loop body
LE: loop exit
PB: predicated region body
PF: predicated region fallthrough
CT: control target
= control target key end

     0   :  { %7 = vsyncpa [#allocation3], 0  ;;  %s2028_s0 = inlined_call_operand.hbm [shape: f32[256,256], index: 0, kind: input, shape index: {}]   ;;  %s2029_s1 = inlined_call_operand.hbm [shape: f32[256,256], index: 1, kind: input, shape index: {}]   ;;  %s2030_s2 = inlined_call_operand.hbm [shape: f32[8,256], index: 2, kind: output, shape index: {}]  }
   0x1   :  { %8 = vsyncpa [#allocation6], 0 }
   0x2   :  { %9 = vsyncpa [#allocation4], 0  ;;  %s778_s9 = smov [#allocation2]  }
   0x3   :  { %s15_s10 = sshll.u32 %s778_s9, 4  ;;  %s16_s10 = int_to_ptr.vmem [resolvable:$true] %s15_s10 }
   0x4   :  { %s720_s11 = scalar_lea.vmem %s16_s10, 8192  ;;  %p725_p1 = scmp.lt.s32.totalorder %s16_s10, %s16_s10 }
   0x5   :  { %p721_p0 = scmp.ne.s32.totalorder %s16_s10, %s720_s11  ;;  %p726_p2 = scmp.lt.s32.totalorder %s720_s11, %s720_s11 }
   0x7   :  { %p727_p3 = por %p726_p2, %p725_p1 }
   0x9   :  { %p728_p4 = pnand %p727_p3, %p721_p0 }
   0xb   :  { %731 = shalt.err (!%p728_p4)
}
   0xc   :  { %s779_s12 = smov 256   ;;  %s780_s13 = smov 16  }
   0xd   :  { %21 = dma.hbm_to_vmem [thread:$0]  %s2028_s0, 8192, %s16_s10, [#allocation3], %s779_s12, %s779_s12, %s780_s13  }
   0xe   :  { %s781_s16 = smov [#allocation5]  }
   0xf   :  { %s27_s17 = sshll.u32 %s781_s16, 4  ;;  %s28_s17 = int_to_ptr.vmem [resolvable:$true] %s27_s17 }
  0x10   :  { %s740_s18 = scalar_lea.vmem %s28_s17, 8192  ;;  %p745_p6 = scmp.lt.s32.totalorder %s28_s17, %s28_s17 }
  0x11   :  { %p741_p5 = scmp.ne.s32.totalorder %s28_s17, %s740_s18  ;;  %p746_p7 = scmp.lt.s32.totalorder %s740_s18, %s740_s18 }
  0x13   :  { %p747_p8 = por %p746_p7, %p745_p6 }
  0x15   :  { %p748_p9 = pnand %p747_p8, %p741_p5 }
  0x17   :  { %751 = shalt.err (!%p748_p9)
}
  0x18   :  { %33 = dma.hbm_to_vmem [thread:$0]  %s2029_s1, 8192, %s28_s17, [#allocation6], %s779_s12, %s779_s12, %s780_s13  }
  0x19   :  { %772 = dma.done.wait [#allocation3], 8192  }
  0x1a   :  { %773 = vsyncadd [#allocation3], 4294959104 }
  0x1b   :  { %774 = dma.done.wait [#allocation6], 8192  }
  0x1c   :  { %775 = vsyncadd [#allocation6], 4294959104  ;;  %v46_v0 = vld [vmem:[#allocation2] sm:$0xff]  ;;  %v47_v1 = vld [vmem:[#allocation2 + $0x8] sm:$0xff]  ;;  %s782_s0 = smov [#allocation7]  }
  0x1d   :  { %v804_v2 = vld [vmem:[#allocation2 + $0x10] sm:$0xff]  ;;  %v110_v3 = vld [vmem:[#allocation5] sm:$0xff]  ;;  %v806_v4 = vld [vmem:[#allocation2 + $0x18] sm:$0xff]  ;;  %s696_s1 = sshll.u32 %s782_s0, 4  ;;  %s697_s1 = int_to_ptr.vmem [resolvable:$true] %s696_s1 }
  0x1e   :  { %v808_v5 = vld [vmem:[#allocation2 + $0x20] sm:$0xff]  ;;  %v111_v6 = vld [vmem:[#allocation5 + $0x8] sm:$0xff]  ;;  %v812_v8 = vld [vmem:[#allocation2 + $0x30] sm:$0xff]  ;;  %v174_v16 = vsub.f32 %v46_v0, %v110_v3  ;;  %s752_s21 = scalar_lea.vmem %s697_s1, 256  ;;  %p757_p11 = scmp.lt.s32.totalorder %s697_s1, %s697_s1 }
  0x1f   :  { %v810_v7 = vld [vmem:[#allocation2 + $0x28] sm:$0xff]  ;;  %v814_v9 = vld [vmem:[#allocation2 + $0x38] sm:$0xff]  ;;  %v112_v10 = vld [vmem:[#allocation5 + $0x10] sm:$0xff]  ;;  %v175_v23 = vsub.f32 %v47_v1, %v111_v6  ;;  %p753_p10 = scmp.ne.s32.totalorder %s697_s1, %s752_s21  ;;  %p758_p12 = scmp.lt.s32.totalorder %s752_s21, %s752_s21 }
  0x20   :  { %v816_v11 = vld [vmem:[#allocation2 + $0x40] sm:$0xff]  ;;  %v818_v12 = vld [vmem:[#allocation2 + $0x48] sm:$0xff]  ;;  %v820_v13 = vld [vmem:[#allocation2 + $0x50] sm:$0xff]  ;;  %v176_v30 = vsub.f32 %v804_v2, %v112_v10  ;;  %v885_v48 = vand.u32 2147483647, %v174_v16 }
  0x21   :  { %v822_v14 = vld [vmem:[#allocation5 + $0x18] sm:$0xff]  ;;  %v824_v15 = vld [vmem:[#allocation5 + $0x20] sm:$0xff]  ;;  %v830_v19 = vld [vmem:[#allocation2 + $0x68] sm:$0xff]  ;;  %v905_v58 = vand.u32 2147483647, %v175_v23  ;;  %p759_p13 = por %p758_p12, %p757_p11 }
  0x22   :  { %v826_v17 = vld [vmem:[#allocation2 + $0x58] sm:$0xff]  ;;  %v828_v18 = vld [vmem:[#allocation2 + $0x60] sm:$0xff]  ;;  %v832_v20 = vld [vmem:[#allocation5 + $0x28] sm:$0xff]  ;;  %v177_v37 = vsub.f32 %v806_v4, %v822_v14  ;;  %v178_v38 = vsub.f32 %v808_v5, %v824_v15  ;;  %2229 = vst [vmem:[#allocation15_spill] sm:$0xff] %v885_v48  ;;  %v925_v4 = vand.u32 2147483647, %v176_v30 }
  0x23   :  { %v834_v21 = vld [vmem:[#allocation5 + $0x30] sm:$0xff]  ;;  %v836_v22 = vld [vmem:[#allocation5 + $0x38] sm:$0xff]  ;;  %v842_v26 = vld [vmem:[#allocation2 + $0x80] sm:$0xff]  ;;  %v179_v45 = vsub.f32 %v810_v7, %v832_v20  ;;  %2234 = vst [vmem:[#allocation20_spill] sm:$0xff] %v905_v58  ;;  %p760_p0 = pnand %p759_p13, %p753_p10 }
  0x24   :  { %v838_v24 = vld [vmem:[#allocation2 + $0x70] sm:$0xff]  ;;  %v840_v25 = vld [vmem:[#allocation2 + $0x78] sm:$0xff]  ;;  %v844_v27 = vld [vmem:[#allocation5 + $0x40] sm:$0xff]  ;;  %v180_v46 = vsub.f32 %v812_v8, %v834_v21  ;;  %2239 = vst [vmem:[#allocation25_spill] sm:$0xff] %v925_v4  ;;  %v945_v21 = vand.u32 2147483647, %v177_v37  ;;  %v2256_v37 = vsub.f32 %v814_v9, %v836_v22 }
  0x25   :  { %v846_v28 = vld [vmem:[#allocation5 + $0x48] sm:$0xff]  ;;  %v848_v29 = vld [vmem:[#allocation5 + $0x50] sm:$0xff]  ;;  %v855_v33 = vld [vmem:[#allocation2 + $0x98] sm:$0xff]  ;;  %v965_v15 = vand.u32 2147483647, %v178_v38 }
  0x26   :  { %v851_v31 = vld [vmem:[#allocation2 + $0x88] sm:$0xff]  ;;  %v853_v32 = vld [vmem:[#allocation2 + $0x90] sm:$0xff]  ;;  %2226 = vst [vmem:[#allocation12_spill] sm:$0xff] %v855_v33  ;;  %v857_v34 = vld [vmem:[#allocation5 + $0x58] sm:$0xff]  ;;  %v985_v16 = vand.u32 2147483647, %v179_v45 }
  0x27   :  { %2225 = vst [vmem:[#allocation11_spill] sm:$0xff] %v853_v32  ;;  %v859_v35 = vld [vmem:[#allocation5 + $0x60] sm:$0xff]  ;;  %v861_v36 = vld [vmem:[#allocation5 + $0x68] sm:$0xff]  ;;  %v871_v41 = vld [vmem:[#allocation2 + $0xb0] sm:$0xff]  ;;  %v1005_v20 = vand.u32 2147483647, %v180_v46 }
  0x28   :  { %v867_v39 = vld [vmem:[#allocation2 + $0xa0] sm:$0xff]  ;;  %v869_v40 = vld [vmem:[#allocation2 + $0xa8] sm:$0xff]  ;;  %2228 = vst [vmem:[#allocation14_spill] sm:$0xff] %v871_v41  ;;  %v873_v42 = vld [vmem:[#allocation5 + $0x70] sm:$0xff] }
  0x29   :  { %2227 = vst [vmem:[#allocation13_spill] sm:$0xff] %v869_v40  ;;  %v875_v43 = vld [vmem:[#allocation5 + $0x78] sm:$0xff]  ;;  %v877_v44 = vld [vmem:[#allocation5 + $0x80] sm:$0xff]  ;;  %v891_v51 = vld [vmem:[#allocation2 + $0xc8] sm:$0xff] }
  0x2a   :  { %v887_v49 = vld [vmem:[#allocation2 + $0xb8] sm:$0xff]  ;;  %v889_v50 = vld [vmem:[#allocation2 + $0xc0] sm:$0xff]  ;;  %2231 = vst [vmem:[#allocation17_spill] sm:$0xff] %v891_v51  ;;  %v893_v52 = vld [vmem:[#allocation5 + $0x88] sm:$0xff] }
  0x2b   :  { %2230 = vst [vmem:[#allocation16_spill] sm:$0xff] %v889_v50  ;;  %v895_v53 = vld [vmem:[#allocation5 + $0x90] sm:$0xff]  ;;  %v897_v54 = vld [vmem:[#allocation5 + $0x98] sm:$0xff]  ;;  %v911_v61 = vld [vmem:[#allocation2 + $0xe0] sm:$0xff] }
  0x2c   :  { %2232 = vst [vmem:[#allocation18_spill] sm:$0xff] %v895_v53  ;;  %2233 = vst [vmem:[#allocation19_spill] sm:$0xff] %v897_v54  ;;  %v907_v59 = vld [vmem:[#allocation2 + $0xd0] sm:$0xff]  ;;  %v909_v60 = vld [vmem:[#allocation2 + $0xd8] sm:$0xff] }
  0x2d   :  { %2235 = vst [vmem:[#allocation21_spill] sm:$0xff] %v911_v61  ;;  %v913_v62 = vld [vmem:[#allocation5 + $0xa0] sm:$0xff]  ;;  %v915_v63 = vld [vmem:[#allocation5 + $0xa8] sm:$0xff]  ;;  %v917_v0 = vld [vmem:[#allocation5 + $0xb0] sm:$0xff] }
  0x2e   :  { %2236 = vst [vmem:[#allocation22_spill] sm:$0xff] %v913_v62  ;;  %2237 = vst [vmem:[#allocation23_spill] sm:$0xff] %v915_v63  ;;  %v927_v5 = vld [vmem:[#allocation2 + $0xe8] sm:$0xff]  ;;  %v929_v6 = vld [vmem:[#allocation2 + $0xf0] sm:$0xff] }
  0x2f   :  { %2238 = vst [vmem:[#allocation24_spill] sm:$0xff] %v917_v0  ;;  %v931_v7 = vld [vmem:[#allocation2 + $0xf8] sm:$0xff]  ;;  %v935_v10 = vld [vmem:[#allocation5 + $0xc0] sm:$0xff]  ;;  %v937_v14 = vld [vmem:[#allocation5 + $0xc8] sm:$0xff] }
  0x30   :  { %2240 = vst [vmem:[#allocation26_spill] sm:$0xff] %v931_v7  ;;  %v933_v8 = vld [vmem:[#allocation5 + $0xb8] sm:$0xff]  ;;  %2241 = vst [vmem:[#allocation27_spill] sm:$0xff] %v935_v10  ;;  %v947_v23 = vld [vmem:[#allocation2 + $0x100] sm:$0xff] }
  0x31   :  { %2242 = vst [vmem:[#allocation28_spill] sm:$0xff] %v937_v14  ;;  %2243 = vst [vmem:[#allocation29_spill] sm:$0xff] %v945_v21  ;;  %v949_v30 = vld [vmem:[#allocation2 + $0x108] sm:$0xff]  ;;  %v951_v3 = vld [vmem:[#allocation2 + $0x110] sm:$0xff] }
  0x32   :  { %2244 = vst [vmem:[#allocation30_spill] sm:$0xff] %v951_v3  ;;  %v953_v2 = vld [vmem:[#allocation5 + $0xd0] sm:$0xff]  ;;  %v955_v1 = vld [vmem:[#allocation5 + $0xd8] sm:$0xff]  ;;  %v957_v57 = vld [vmem:[#allocation5 + $0xe0] sm:$0xff] }
  0x33   :  { %2245 = vst [vmem:[#allocation31_spill] sm:$0xff] %v953_v2  ;;  %2246 = vst [vmem:[#allocation32_spill] sm:$0xff] %v955_v1  ;;  %v967_v56 = vld [vmem:[#allocation2 + $0x118] sm:$0xff]  ;;  %v969_v55 = vld [vmem:[#allocation2 + $0x120] sm:$0xff] }
  0x34   :  { %2247 = vst [vmem:[#allocation33_spill] sm:$0xff] %v957_v57  ;;  %2248 = vst [vmem:[#allocation34_spill] sm:$0xff] %v965_v15  ;;  %v971_v47 = vld [vmem:[#allocation2 + $0x128] sm:$0xff]  ;;  %v975_v4 = vld [vmem:[#allocation5 + $0xf0] sm:$0xff] }
  0x35   :  { %v973_v21 = vld [vmem:[#allocation5 + $0xe8] sm:$0xff]  ;;  %2250 = vst [vmem:[#allocation36_spill] sm:$0xff] %v975_v4  ;;  %v977_v58 = vld [vmem:[#allocation5 + $0xf8] sm:$0xff]  ;;  %2252 = vst [vmem:[#allocation38_spill] sm:$0xff] %v985_v16 }
  0x36   :  { %2249 = vst [vmem:[#allocation35_spill] sm:$0xff] %v973_v21  ;;  %2251 = vst [vmem:[#allocation37_spill] sm:$0xff] %v977_v58  ;;  %v987_v15 = vld [vmem:[#allocation2 + $0x130] sm:$0xff]  ;;  %v989_v48 = vld [vmem:[#allocation2 + $0x138] sm:$0xff] }
  0x37   :  { %v991_v54 = vld [vmem:[#allocation2 + $0x140] sm:$0xff]  ;;  %v995_v53 = vld [vmem:[#allocation5 + $0x108] sm:$0xff]  ;;  %v997_v32 = vld [vmem:[#allocation5 + $0x110] sm:$0xff]  ;;  %2254 = vst [vmem:[#allocation40_spill] sm:$0xff] %v1005_v20  ;;  %v1028_v20 = vand.u32 2147483647, %v2256_v37  ;;  %v2259_v37 = vsub.f32 %v816_v11, %v844_v27 }
  0x38   :  { %v993_v33 = vld [vmem:[#allocation5 + $0x100] sm:$0xff]  ;;  %2253 = vst [vmem:[#allocation39_spill] sm:$0xff] %v997_v32  ;;  %v1007_v16 = vld [vmem:[#allocation2 + $0x148] sm:$0xff]  ;;  %v1009_v0 = vld [vmem:[#allocation2 + $0x150] sm:$0xff] }
  0x39   :  { %v1011_v41 = vld [vmem:[#allocation2 + $0x158] sm:$0xff]  ;;  %v1015_v40 = vld [vmem:[#allocation5 + $0x120] sm:$0xff]  ;;  %v1017_v62 = vld [vmem:[#allocation5 + $0x128] sm:$0xff]  ;;  %2257 = vst [vmem:[#allocation42_spill] sm:$0xff] %v1028_v20  ;;  %v1051_v45 = vand.u32 2147483647, %v2259_v37  ;;  %v2262_v37 = vsub.f32 %v818_v12, %v846_v28  ;;  %v2266_v28 = vsub.f32 %v820_v13, %v848_v29  ;;  %v2269_v13 = vsub.f32 %v826_v17, %v857_v34 }
  0x3a   :  { %v1013_v63 = vld [vmem:[#allocation5 + $0x118] sm:$0xff]  ;;  %2255 = vst [vmem:[#allocation41_spill] sm:$0xff] %v1017_v62  ;;  %v1030_v14 = vld [vmem:[#allocation2 + $0x160] sm:$0xff]  ;;  %v1032_v51 = vld [vmem:[#allocation2 + $0x168] sm:$0xff]  ;;  %v2272_v17 = vsub.f32 %v828_v18, %v859_v35  ;;  %v2274_v18 = vsub.f32 %v830_v19, %v861_v36  ;;  %v2276_v19 = vsub.f32 %v838_v24, %v873_v42  ;;  %v2278_v12 = vsub.f32 %v840_v25, %v875_v43 }
  0x3b   :  { %v1034_v10 = vld [vmem:[#allocation2 + $0x170] sm:$0xff]  ;;  %v1038_v38 = vld [vmem:[#allocation5 + $0x138] sm:$0xff]  ;;  %v1040_v2 = vld [vmem:[#allocation5 + $0x140] sm:$0xff]  ;;  %2260 = vst [vmem:[#allocation44_spill] sm:$0xff] %v1051_v45  ;;  %v1074_v9 = vand.u32 2147483647, %v2262_v37  ;;  %v2280_v24 = vsub.f32 %v842_v26, %v877_v44 }
  0x3c   :  { %v1036_v50 = vld [vmem:[#allocation5 + $0x130] sm:$0xff]  ;;  %2258 = vst [vmem:[#allocation43_spill] sm:$0xff] %v1040_v2  ;;  %v1053_v20 = vld [vmem:[#allocation2 + $0x178] sm:$0xff]  ;;  %v1055_v57 = vld [vmem:[#allocation2 + $0x180] sm:$0xff]  ;;  %v1095_v37 = vand.u32 2147483647, %v2266_v28 }
  0x3d   :  { %v1057_v61 = vld [vmem:[#allocation2 + $0x188] sm:$0xff]  ;;  %v1061_v46 = vld [vmem:[#allocation5 + $0x150] sm:$0xff]  ;;  %v1063_v21 = vld [vmem:[#allocation5 + $0x158] sm:$0xff]  ;;  %2263 = vst [vmem:[#allocation46_spill] sm:$0xff] %v1074_v9  ;;  %v1112_v29 = vand.u32 2147483647, %v2269_v13 }
  0x3e   :  { %v1059_v1 = vld [vmem:[#allocation5 + $0x148] sm:$0xff]  ;;  %2261 = vst [vmem:[#allocation45_spill] sm:$0xff] %v1063_v21  ;;  %v1076_v45 = vld [vmem:[#allocation2 + $0x190] sm:$0xff]  ;;  %v1078_v58 = vld [vmem:[#allocation2 + $0x198] sm:$0xff]  ;;  %v1129_v34 = vand.u32 2147483647, %v2272_v17 }
  0x3f   :  { %2264 = vst [vmem:[#allocation47_spill] sm:$0xff] %v1076_v45  ;;  %v1080_v7 = vld [vmem:[#allocation5 + $0x160] sm:$0xff]  ;;  %v1082_v4 = vld [vmem:[#allocation5 + $0x168] sm:$0xff]  ;;  %v1084_v22 = vld [vmem:[#allocation5 + $0x170] sm:$0xff]  ;;  %v1146_v35 = vand.u32 2147483647, %v2274_v18 }
  0x40   :  { %2265 = vst [vmem:[#allocation48_spill] sm:$0xff] %v1084_v22  ;;  %2267 = vst [vmem:[#allocation49_spill] sm:$0xff] %v1095_v37  ;;  %v1097_v9 = vld [vmem:[#allocation5 + $0x178] sm:$0xff]  ;;  %v1099_v32 = vld [vmem:[#allocation5 + $0x180] sm:$0xff]  ;;  %v1163_v36 = vand.u32 2147483647, %v2276_v19 }
  0x41   :  { %v1101_v3 = vld [vmem:[#allocation5 + $0x188] sm:$0xff]  ;;  %2270 = vst [vmem:[#allocation51_spill] sm:$0xff] %v1112_v29  ;;  %v1114_v28 = vld [vmem:[#allocation2 + $0x1a0] sm:$0xff]  ;;  %v1116_v37 = vld [vmem:[#allocation5 + $0x190] sm:$0xff]  ;;  %v1183_v42 = vand.u32 2147483647, %v2280_v24 }
  0x42   :  { %2268 = vst [vmem:[#allocation50_spill] sm:$0xff] %v1101_v3  ;;  %2271 = vst [vmem:[#allocation52_spill] sm:$0xff] %v1116_v37  ;;  %v1118_v62 = vld [vmem:[#allocation5 + $0x198] sm:$0xff]  ;;  %v1131_v13 = vld [vmem:[#allocation2 + $0x1a8] sm:$0xff]  ;;  %v1178_v3 = vand.u32 2147483647, %v2278_v12 }
  0x43   :  { %2273 = vst [vmem:[#allocation53_spill] sm:$0xff] %v1129_v34  ;;  %v1133_v29 = vld [vmem:[#allocation2 + $0x1b0] sm:$0xff]  ;;  %v1135_v2 = vld [vmem:[#allocation5 + $0x1a0] sm:$0xff]  ;;  %2275 = vst [vmem:[#allocation54_spill] sm:$0xff] %v1146_v35  ;;  %v225_v27 = vsub.f32 %v1078_v58, %v1118_v62  ;;  %v2282_v58 = vsub.f32 %v851_v31, %v893_v52 }
  0x44   :  { %v1148_v17 = vld [vmem:[#allocation2 + $0x1b8] sm:$0xff]  ;;  %v1150_v34 = vld [vmem:[#allocation5 + $0x1a8] sm:$0xff]  ;;  %v1152_v21 = vld [vmem:[#allocation5 + $0x1b0] sm:$0xff]  ;;  %2277 = vst [vmem:[#allocation55_spill] sm:$0xff] %v1163_v36  ;;  %v226_v11 = vsub.f32 %v1114_v28, %v1135_v2 }
  0x45   :  { %v1165_v18 = vld [vmem:[#allocation2 + $0x1c0] sm:$0xff]  ;;  %v1167_v35 = vld [vmem:[#allocation5 + $0x1b8] sm:$0xff]  ;;  %2279 = vst [vmem:[#allocation56_spill] sm:$0xff] %v1178_v3  ;;  %2281 = vst [vmem:[#allocation57_spill] sm:$0xff] %v1183_v42  ;;  %v1194_v62 = vand.u32 2147483647, %v2282_v58  ;;  %v227_v2 = vsub.f32 %v1131_v13, %v1150_v34  ;;  %v228_v34 = vsub.f32 %v1133_v29, %v1152_v21 }
  0x46   :  { %v1169_v22 = vld [vmem:[#allocation5 + $0x1c0] sm:$0xff]  ;;  %v1185_v19 = vld [vmem:[#allocation2 + $0x1c8] sm:$0xff]  ;;  %v2284_v25 = vld [vmem:[#allocation11_spill] sm:$0xff]  ;;  %v229_v21 = vsub.f32 %v1148_v17, %v1167_v35 }
  0x47   :  { %v1187_v36 = vld [vmem:[#allocation5 + $0x1c8] sm:$0xff]  ;;  %2283 = vst [vmem:[#allocation58_spill] sm:$0xff] %v1194_v62  ;;  %v2288_v26 = vld [vmem:[#allocation12_spill] sm:$0xff]  ;;  %v2289_v44 = vld [vmem:[#allocation19_spill] sm:$0xff]  ;;  %v230_v35 = vsub.f32 %v1165_v18, %v1169_v22 }
  0x48   :  { %v2285_v43 = vld [vmem:[#allocation18_spill] sm:$0xff]  ;;  %v2290_v24 = vsub.f32 %v2288_v26, %v2289_v44  ;;  %v104_v37 = vld [vmem:[#allocation2 + $0x1d0] sm:$0xff]  ;;  %v2295_v58 = vld [vmem:[#allocation13_spill] sm:$0xff]  ;;  %v231_v22 = vsub.f32 %v1185_v19, %v1187_v36  ;;  %v2341_v36 = vsub.f32 %v967_v56, %v1013_v63  ;;  %v2350_v56 = vsub.f32 %v989_v48, %v1038_v38 }
  0x49   :  { %v2286_v12 = vsub.f32 %v2284_v25, %v2285_v43  ;;  %v168_v45 = vld [vmem:[#allocation5 + $0x1d0] sm:$0xff]  ;;  %v2292_v28 = vld [vmem:[#allocation22_spill] sm:$0xff]  ;;  %v2359_v48 = vld [vmem:[#allocation45_spill] sm:$0xff] }
  0x4a   :  { %v1204_v42 = vand.u32 2147483647, %v2290_v24  ;;  %v2293_v31 = vsub.f32 %v867_v39, %v2292_v28  ;;  %v2296_v62 = vld [vmem:[#allocation23_spill] sm:$0xff]  ;;  %v105_v24 = vld [vmem:[#allocation2 + $0x1d8] sm:$0xff]  ;;  %v2303_v39 = vsub.f32 %v887_v49, %v933_v8  ;;  %v1294_v19 = vand.u32 2147483647, %v2341_v36 }
  0x4b   :  { %v1199_v3 = vand.u32 2147483647, %v2286_v12  ;;  %v2297_v25 = vsub.f32 %v2295_v58, %v2296_v62  ;;  %v2299_v12 = vld [vmem:[#allocation14_spill] sm:$0xff]  ;;  %v2305_v28 = vld [vmem:[#allocation16_spill] sm:$0xff]  ;;  %v2313_v29 = vld [vmem:[#allocation31_spill] sm:$0xff]  ;;  %v2360_v38 = vsub.f32 %v1011_v41, %v2359_v48  ;;  %v2369_v41 = vsub.f32 %v1053_v20, %v1097_v9 }
  0x4c   :  { %2291 = vst [vmem:[#allocation18_spill] sm:$0xff] %v1204_v42  ;;  %v1211_v52 = vand.u32 2147483647, %v2293_v31  ;;  %v169_v42 = vld [vmem:[#allocation5 + $0x1d8] sm:$0xff]  ;;  %v1228_v13 = vand.u32 2147483647, %v2303_v39  ;;  %v2314_v49 = vsub.f32 %v907_v59, %v2313_v29 }
  0x4d   :  { %2287 = vst [vmem:[#allocation11_spill] sm:$0xff] %v1199_v3  ;;  %v1216_v43 = vand.u32 2147483647, %v2297_v25  ;;  %v2300_v3 = vld [vmem:[#allocation24_spill] sm:$0xff]  ;;  %v2306_v31 = vld [vmem:[#allocation27_spill] sm:$0xff]  ;;  %v2309_v25 = vld [vmem:[#allocation17_spill] sm:$0xff] }
  0x4e   :  { %2294 = vst [vmem:[#allocation12_spill] sm:$0xff] %v1211_v52  ;;  %v2301_v26 = vsub.f32 %v2299_v12, %v2300_v3  ;;  %2304 = vst [vmem:[#allocation13_spill] sm:$0xff] %v1228_v13  ;;  %v2307_v62 = vsub.f32 %v2305_v28, %v2306_v31  ;;  %v1245_v8 = vand.u32 2147483647, %v2314_v49  ;;  %v2316_v39 = vld [vmem:[#allocation32_spill] sm:$0xff]  ;;  %v2323_v17 = vld [vmem:[#allocation35_spill] sm:$0xff] }
  0x4f   :  { %2298 = vst [vmem:[#allocation19_spill] sm:$0xff] %v1216_v43  ;;  %v2310_v43 = vld [vmem:[#allocation28_spill] sm:$0xff]  ;;  %v2317_v28 = vsub.f32 %v909_v60, %v2316_v39  ;;  %v2324_v59 = vsub.f32 %v927_v5, %v2323_v17  ;;  %v2333_v5 = vsub.f32 %v947_v23, %v993_v33  ;;  %2342 = vst [vmem:[#allocation35_spill] sm:$0xff] %v1294_v19  ;;  %v1314_v63 = vand.u32 2147483647, %v2350_v56 }
  0x50   :  { %v1221_v44 = vand.u32 2147483647, %v2301_v26  ;;  %v1233_v58 = vand.u32 2147483647, %v2307_v62  ;;  %v2311_v3 = vsub.f32 %v2309_v25, %v2310_v43  ;;  %v106_v26 = vld [vmem:[#allocation2 + $0x1e0] sm:$0xff]  ;;  %2315 = vst [vmem:[#allocation24_spill] sm:$0xff] %v1245_v8  ;;  %v2343_v33 = vsub.f32 %v969_v55, %v1015_v40 }
  0x51   :  { %v1250_v31 = vand.u32 2147483647, %v2317_v28  ;;  %v2319_v62 = vld [vmem:[#allocation21_spill] sm:$0xff]  ;;  %v1262_v29 = vand.u32 2147483647, %v2324_v59  ;;  %v2326_v49 = vld [vmem:[#allocation36_spill] sm:$0xff] }
  0x52   :  { %2302 = vst [vmem:[#allocation22_spill] sm:$0xff] %v1221_v44  ;;  %2308 = vst [vmem:[#allocation23_spill] sm:$0xff] %v1233_v58  ;;  %v1238_v12 = vand.u32 2147483647, %v2311_v3  ;;  %v170_v44 = vld [vmem:[#allocation5 + $0x1e0] sm:$0xff]  ;;  %v107_v3 = vld [vmem:[#allocation2 + $0x1e8] sm:$0xff]  ;;  %v2327_v60 = vsub.f32 %v929_v6, %v2326_v49  ;;  %v2335_v6 = vsub.f32 %v949_v30, %v995_v53 }
  0x53   :  { %2318 = vst [vmem:[#allocation16_spill] sm:$0xff] %v1250_v31  ;;  %v2320_v58 = vld [vmem:[#allocation33_spill] sm:$0xff]  ;;  %2325 = vst [vmem:[#allocation17_spill] sm:$0xff] %v1262_v29  ;;  %v2329_v28 = vld [vmem:[#allocation26_spill] sm:$0xff]  ;;  %v1279_v18 = vand.u32 2147483647, %v2333_v5 }
  0x54   :  { %2312 = vst [vmem:[#allocation14_spill] sm:$0xff] %v1238_v12  ;;  %v2321_v43 = vsub.f32 %v2319_v62, %v2320_v58  ;;  %v171_v12 = vld [vmem:[#allocation5 + $0x1e8] sm:$0xff]  ;;  %v1267_v39 = vand.u32 2147483647, %v2327_v60  ;;  %v2330_v31 = vld [vmem:[#allocation37_spill] sm:$0xff]  ;;  %v2338_v49 = vld [vmem:[#allocation39_spill] sm:$0xff] }
  0x55   :  { %v2331_v58 = vsub.f32 %v2329_v28, %v2330_v31  ;;  %2334 = vst [vmem:[#allocation32_spill] sm:$0xff] %v1279_v18  ;;  %v1284_v17 = vand.u32 2147483647, %v2335_v6  ;;  %v2337_v59 = vld [vmem:[#allocation30_spill] sm:$0xff]  ;;  %v109_v28 = vld [vmem:[#allocation2 + $0x1f8] sm:$0xff]  ;;  %v2345_v53 = vld [vmem:[#allocation41_spill] sm:$0xff]  ;;  %v233_v6 = vsub.f32 %v105_v24, %v169_v42 }
  0x56   :  { %v1255_v25 = vand.u32 2147483647, %v2321_v43  ;;  %2328 = vst [vmem:[#allocation28_spill] sm:$0xff] %v1267_v39  ;;  %v108_v43 = vld [vmem:[#allocation2 + $0x1f0] sm:$0xff]  ;;  %v2339_v31 = vsub.f32 %v2337_v59, %v2338_v49  ;;  %v1299_v23 = vand.u32 2147483647, %v2343_v33  ;;  %v2346_v30 = vsub.f32 %v971_v47, %v2345_v53 }
  0x57   :  { %v1272_v62 = vand.u32 2147483647, %v2331_v58  ;;  %2336 = vst [vmem:[#allocation21_spill] sm:$0xff] %v1284_v17  ;;  %v173_v58 = vld [vmem:[#allocation5 + $0x1f8] sm:$0xff]  ;;  %v2348_v59 = vsub.f32 %v987_v15, %v1036_v50  ;;  %2351 = vst [vmem:[#allocation30_spill] sm:$0xff] %v1314_v63  ;;  %v2352_v40 = vld [vmem:[#allocation43_spill] sm:$0xff]  ;;  %v234_v49 = vsub.f32 %v106_v26, %v170_v44  ;;  %v2355_v47 = vsub.f32 %v1007_v16, %v1059_v1 }
  0x58   :  { %2322 = vst [vmem:[#allocation27_spill] sm:$0xff] %v1255_v25  ;;  %v172_v25 = vld [vmem:[#allocation5 + $0x1f0] sm:$0xff]  ;;  %v1289_v60 = vand.u32 2147483647, %v2339_v31  ;;  %2344 = vst [vmem:[#allocation36_spill] sm:$0xff] %v1299_v23  ;;  %v2353_v55 = vsub.f32 %v991_v54, %v2352_v40  ;;  %v2357_v50 = vsub.f32 %v1009_v0, %v1061_v46  ;;  %v235_v31 = vsub.f32 %v107_v3, %v171_v12  ;;  %v2366_v0 = vld [vmem:[#allocation48_spill] sm:$0xff] }
  0x59   :  { %2332 = vst [vmem:[#allocation31_spill] sm:$0xff] %v1272_v62  ;;  %v232_v62 = vsub.f32 %v104_v37, %v168_v45  ;;  %v1304_v5 = vand.u32 2147483647, %v2346_v30  ;;  %v1309_v45 = vand.u32 2147483647, %v2348_v59  ;;  %v2362_v54 = vsub.f32 %v1030_v14, %v1080_v7  ;;  %v2377_v53 = vld [vmem:[#allocation52_spill] sm:$0xff] }
  0x5a   :  { %2340 = vst [vmem:[#allocation33_spill] sm:$0xff] %v1289_v60  ;;  %v1319_v37 = vand.u32 2147483647, %v2353_v55  ;;  %v1324_v42 = vand.u32 2147483647, %v2355_v47  ;;  %v2364_v1 = vsub.f32 %v1032_v51, %v1082_v4  ;;  %v2367_v46 = vsub.f32 %v1034_v10, %v2366_v0  ;;  %v2373_v51 = vld [vmem:[#allocation50_spill] sm:$0xff] }
  0x5b   :  { %2347 = vst [vmem:[#allocation26_spill] sm:$0xff] %v1304_v5  ;;  %2349 = vst [vmem:[#allocation37_spill] sm:$0xff] %v1309_v45  ;;  %v1329_v15 = vand.u32 2147483647, %v2357_v50  ;;  %v1334_v24 = vand.u32 2147483647, %v2360_v38  ;;  %v236_v36 = vsub.f32 %v108_v43, %v172_v25  ;;  %v2371_v7 = vsub.f32 %v1055_v57, %v1099_v32 }
  0x5c   :  { %2354 = vst [vmem:[#allocation39_spill] sm:$0xff] %v1319_v37  ;;  %2356 = vst [vmem:[#allocation41_spill] sm:$0xff] %v1324_v42  ;;  %v1339_v44 = vand.u32 2147483647, %v2362_v54  ;;  %v1344_v16 = vand.u32 2147483647, %v2364_v1  ;;  %v2374_v4 = vsub.f32 %v1057_v61, %v2373_v51  ;;  %v237_v33 = vsub.f32 %v109_v28, %v173_v58 }
  0x5d   :  { %2358 = vst [vmem:[#allocation43_spill] sm:$0xff] %v1329_v15  ;;  %2361 = vst [vmem:[#allocation45_spill] sm:$0xff] %v1334_v24  ;;  %v1349_v26 = vand.u32 2147483647, %v2367_v46  ;;  %v1354_v12 = vand.u32 2147483647, %v2369_v41 }
  0x5e   :  { %2363 = vst [vmem:[#allocation59_spill] sm:$0xff] %v1339_v44  ;;  %2365 = vst [vmem:[#allocation60_spill] sm:$0xff] %v1344_v16  ;;  %v1359_v14 = vand.u32 2147483647, %v2371_v7  ;;  %v1364_v3 = vand.u32 2147483647, %v2374_v4 }
  0x5f   :  { %2368 = vst [vmem:[#allocation48_spill] sm:$0xff] %v1349_v26  ;;  %2370 = vst [vmem:[#allocation61_spill] sm:$0xff] %v1354_v12  ;;  %v2376_v10 = vld [vmem:[#allocation47_spill] sm:$0xff]  ;;  %v1371_v43 = vand.u32 2147483647, %v225_v27  ;;  %v2403_v50 = vld [vmem:[#allocation38_spill] sm:$0xff] }
  0x60   :  { %2372 = vst [vmem:[#allocation62_spill] sm:$0xff] %v1359_v14  ;;  %2375 = vst [vmem:[#allocation50_spill] sm:$0xff] %v1364_v3  ;;  %v2378_v30 = vsub.f32 %v2376_v10, %v2377_v53  ;;  %v1373_v20 = vand.u32 2147483647, %v226_v11  ;;  %v1375_v9 = vand.u32 2147483647, %v227_v2 }
  0x61   :  { %2380 = vst [vmem:[#allocation52_spill] sm:$0xff] %v1371_v43  ;;  %v1377_v32 = vand.u32 2147483647, %v228_v34  ;;  %v1379_v57 = vand.u32 2147483647, %v229_v21  ;;  %v2393_v34 = vld [vmem:[#allocation15_spill] sm:$0xff] }
  0x62   :  { %v1369_v25 = vand.u32 2147483647, %v2378_v30  ;;  %2381 = vst [vmem:[#allocation63_spill] sm:$0xff] %v1373_v20  ;;  %2382 = vst [vmem:[#allocation64_spill] sm:$0xff] %v1375_v9  ;;  %v1381_v59 = vand.u32 2147483647, %v230_v35 }
  0x63   :  { %2383 = vst [vmem:[#allocation65_spill] sm:$0xff] %v1377_v32  ;;  %2384 = vst [vmem:[#allocation66_spill] sm:$0xff] %v1379_v57  ;;  %v1383_v61 = vand.u32 2147483647, %v231_v22  ;;  %v1385_v28 = vand.u32 2147483647, %v232_v62 }
  0x64   :  { %2379 = vst [vmem:[#allocation47_spill] sm:$0xff] %v1369_v25  ;;  %2385 = vst [vmem:[#allocation67_spill] sm:$0xff] %v1381_v59  ;;  %v1387_v58 = vand.u32 2147483647, %v233_v6  ;;  %v1389_v56 = vand.u32 2147483647, %v234_v49 }
  0x65   :  { %2386 = vst [vmem:[#allocation68_spill] sm:$0xff] %v1383_v61  ;;  %2387 = vst [vmem:[#allocation69_spill] sm:$0xff] %v1385_v28  ;;  %v1391_v27 = vand.u32 2147483647, %v235_v31  ;;  %v1393_v11 = vand.u32 2147483647, %v236_v36 }
  0x66   :  { %2388 = vst [vmem:[#allocation70_spill] sm:$0xff] %v1387_v58  ;;  %2389 = vst [vmem:[#allocation71_spill] sm:$0xff] %v1389_v56  ;;  %v1395_v2 = vand.u32 2147483647, %v237_v33  ;;  %v1398_v40 = vmin.f32 %v2393_v34, 1.0  ;;  %v2395_v21 = vld [vmem:[#allocation20_spill] sm:$0xff] }
  0x67   :  { %2390 = vst [vmem:[#allocation72_spill] sm:$0xff] %v1391_v27  ;;  %2391 = vst [vmem:[#allocation73_spill] sm:$0xff] %v1393_v11  ;;  %v1401_v35 = vmin.f32 %v2395_v21, 1.0  ;;  %v2397_v22 = vld [vmem:[#allocation25_spill] sm:$0xff]  ;;  %v2401_v49 = vld [vmem:[#allocation34_spill] sm:$0xff]  ;;  %v1413_v48 = vmin.f32 %v2403_v50, 1.0 }
  0x68   :  { %2392 = vst [vmem:[#allocation74_spill] sm:$0xff] %v1395_v2  ;;  %2394 = vst [vmem:[#allocation15_spill] sm:$0xff] %v1398_v40  ;;  %v1404_v55 = vmin.f32 %v2397_v22, 1.0  ;;  %v2399_v62 = vld [vmem:[#allocation29_spill] sm:$0xff]  ;;  %v1410_v47 = vmin.f32 %v2401_v49, 1.0  ;;  %v2404_v38 = vld [vmem:[#allocation40_spill] sm:$0xff] }
  0x69   :  { %2396 = vst [vmem:[#allocation20_spill] sm:$0xff] %v1401_v35  ;;  %v1407_v6 = vmin.f32 %v2399_v62, 1.0  ;;  %v1416_v31 = vmin.f32 %v2404_v38, 1.0  ;;  %v2406_v54 = vld [vmem:[#allocation42_spill] sm:$0xff]  ;;  %v2408_v0 = vld [vmem:[#allocation44_spill] sm:$0xff]  ;;  %v2412_v7 = vld [vmem:[#allocation49_spill] sm:$0xff] }
  0x6a   :  { %2398 = vst [vmem:[#allocation25_spill] sm:$0xff] %v1404_v55  ;;  %2402 = vst [vmem:[#allocation75_spill] sm:$0xff] %v1410_v47  ;;  %v1419_v1 = vmin.f32 %v2406_v54, 1.0  ;;  %v1422_v46 = vmin.f32 %v2408_v0, 1.0  ;;  %v2410_v36 = vld [vmem:[#allocation46_spill] sm:$0xff]  ;;  %v1428_v51 = vmin.f32 %v2412_v7, 1.0 }
  0x6b   :  { %2400 = vst [vmem:[#allocation29_spill] sm:$0xff] %v1407_v6  ;;  %2405 = vst [vmem:[#allocation76_spill] sm:$0xff] %v1416_v31  ;;  %v1425_v41 = vmin.f32 %v2410_v36, 1.0  ;;  %v2414_v4 = vld [vmem:[#allocation51_spill] sm:$0xff]  ;;  %v2416_v10 = vld [vmem:[#allocation53_spill] sm:$0xff] }
  0x6c   :  { %2407 = vst [vmem:[#allocation77_spill] sm:$0xff] %v1419_v1  ;;  %2409 = vst [vmem:[#allocation78_spill] sm:$0xff] %v1422_v46  ;;  %v1431_v33 = vmin.f32 %v2414_v4, 1.0  ;;  %v1434_v53 = vmin.f32 %v2416_v10, 1.0  ;;  %v2418_v30 = vld [vmem:[#allocation54_spill] sm:$0xff]  ;;  %v2420_v54 = vld [vmem:[#allocation55_spill] sm:$0xff] }
  0x6d   :  { %2411 = vst [vmem:[#allocation79_spill] sm:$0xff] %v1425_v41  ;;  %2413 = vst [vmem:[#allocation80_spill] sm:$0xff] %v1428_v51  ;;  %v1437_v38 = vmin.f32 %v2418_v30, 1.0  ;;  %v1440_v1 = vmin.f32 %v2420_v54, 1.0  ;;  %v2422_v0 = vld [vmem:[#allocation56_spill] sm:$0xff]  ;;  %v2424_v36 = vld [vmem:[#allocation57_spill] sm:$0xff] }
  0x6e   :  { %2415 = vst [vmem:[#allocation81_spill] sm:$0xff] %v1431_v33  ;;  %2417 = vst [vmem:[#allocation82_spill] sm:$0xff] %v1434_v53  ;;  %v1443_v46 = vmin.f32 %v2422_v0, 1.0  ;;  %v1446_v41 = vmin.f32 %v2424_v36, 1.0  ;;  %v2426_v7 = vld [vmem:[#allocation58_spill] sm:$0xff]  ;;  %v2428_v4 = vld [vmem:[#allocation11_spill] sm:$0xff] }
  0x6f   :  { %2419 = vst [vmem:[#allocation83_spill] sm:$0xff] %v1437_v38  ;;  %2421 = vst [vmem:[#allocation84_spill] sm:$0xff] %v1440_v1  ;;  %v1449_v51 = vmin.f32 %v2426_v7, 1.0  ;;  %v1452_v33 = vmin.f32 %v2428_v4, 1.0  ;;  %v2430_v10 = vld [vmem:[#allocation18_spill] sm:$0xff]  ;;  %v1458_v30 = vmin.f32 %v1211_v52, 1.0 }
  0x70   :  { %2423 = vst [vmem:[#allocation85_spill] sm:$0xff] %v1443_v46  ;;  %2425 = vst [vmem:[#allocation86_spill] sm:$0xff] %v1446_v41  ;;  %v1455_v53 = vmin.f32 %v2430_v10, 1.0  ;;  %v2432_v54 = vld [vmem:[#allocation19_spill] sm:$0xff]  ;;  %v2434_v0 = vld [vmem:[#allocation22_spill] sm:$0xff]  ;;  %v1467_v36 = vmin.f32 %v1228_v13, 1.0 }
  0x71   :  { %2427 = vst [vmem:[#allocation87_spill] sm:$0xff] %v1449_v51  ;;  %2429 = vst [vmem:[#allocation88_spill] sm:$0xff] %v1452_v33  ;;  %v1461_v1 = vmin.f32 %v2432_v54, 1.0  ;;  %v1464_v46 = vmin.f32 %v2434_v0, 1.0  ;;  %v2435_v7 = vld [vmem:[#allocation23_spill] sm:$0xff]  ;;  %v2437_v4 = vld [vmem:[#allocation14_spill] sm:$0xff] }
  0x72   :  { %2431 = vst [vmem:[#allocation89_spill] sm:$0xff] %v1458_v30  ;;  %v1470_v51 = vmin.f32 %v2435_v7, 1.0  ;;  %v1473_v33 = vmin.f32 %v2437_v4, 1.0  ;;  %v1476_v10 = vmin.f32 %v1245_v8, 1.0  ;;  %v2438_v52 = vld [vmem:[#allocation16_spill] sm:$0xff]  ;;  %v2439_v54 = vld [vmem:[#allocation27_spill] sm:$0xff] }
  0x73   :  { %2433 = vst [vmem:[#allocation90_spill] sm:$0xff] %v1461_v1  ;;  %v1479_v30 = vmin.f32 %v2438_v52, 1.0  ;;  %v1482_v1 = vmin.f32 %v2439_v54, 1.0  ;;  %v1485_v0 = vmin.f32 %v1262_v29, 1.0  ;;  %v1488_v13 = vmin.f32 %v1267_v39, 1.0  ;;  %v2440_v7 = vld [vmem:[#allocation31_spill] sm:$0xff] }
  0x74   :  { %2436 = vst [vmem:[#allocation91_spill] sm:$0xff] %v1470_v51  ;;  %v1491_v51 = vmin.f32 %v2440_v7, 1.0  ;;  %v1494_v4 = vmin.f32 %v1279_v18, 1.0  ;;  %v1497_v8 = vmin.f32 %v1284_v17, 1.0  ;;  %v1500_v52 = vmin.f32 %v1289_v60, 1.0 }
  0x75   :  { %v1503_v54 = vmin.f32 %v1294_v19, 1.0  ;;  %v1506_v29 = vmin.f32 %v1299_v23, 1.0  ;;  %v1509_v39 = vmin.f32 %v1304_v5, 1.0  ;;  %v1512_v7 = vmin.f32 %v1309_v45, 1.0 }
  0x76   :  { %v1515_v18 = vmin.f32 %v1314_v63, 1.0  ;;  %v1518_v17 = vmin.f32 %v1319_v37, 1.0  ;;  %v1521_v60 = vmin.f32 %v1324_v42, 1.0  ;;  %v1524_v19 = vmin.f32 %v1329_v15, 1.0  ;;  %v2476_v31 = vld [vmem:[#allocation84_spill] sm:$0xff] }
  0x77   :  { %v1527_v23 = vmin.f32 %v1334_v24, 1.0  ;;  %v1530_v5 = vmin.f32 %v1339_v44, 1.0  ;;  %v1533_v45 = vmin.f32 %v1344_v16, 1.0  ;;  %v1536_v63 = vmin.f32 %v1349_v26, 1.0 }
  0x78   :  { %v1539_v37 = vmin.f32 %v1354_v12, 1.0  ;;  %v1542_v42 = vmin.f32 %v1359_v14, 1.0  ;;  %v1545_v15 = vmin.f32 %v1364_v3, 1.0  ;;  %v1548_v24 = vmin.f32 %v1369_v25, 1.0 }
  0x79   :  { %2441 = vst [vmem:[#allocation92_spill] sm:$0xff] %v1527_v23  ;;  %2442 = vst [vmem:[#allocation93_spill] sm:$0xff] %v1530_v5  ;;  %v1551_v44 = vmin.f32 %v1371_v43, 1.0  ;;  %v1554_v16 = vmin.f32 %v1373_v20, 1.0  ;;  %v1557_v26 = vmin.f32 %v1375_v9, 1.0  ;;  %v1560_v12 = vmin.f32 %v1377_v32, 1.0 }
  0x7a   :  { %2443 = vst [vmem:[#allocation94_spill] sm:$0xff] %v1533_v45  ;;  %2444 = vst [vmem:[#allocation95_spill] sm:$0xff] %v1536_v63  ;;  %v1563_v14 = vmin.f32 %v1379_v57, 1.0  ;;  %v1566_v3 = vmin.f32 %v1381_v59, 1.0  ;;  %v1569_v25 = vmin.f32 %v1383_v61, 1.0  ;;  %v1572_v43 = vmin.f32 %v1385_v28, 1.0 }
  0x7b   :  { %2445 = vst [vmem:[#allocation96_spill] sm:$0xff] %v1539_v37  ;;  %2446 = vst [vmem:[#allocation97_spill] sm:$0xff] %v1542_v42  ;;  %v1575_v20 = vmin.f32 %v1387_v58, 1.0  ;;  %v1578_v9 = vmin.f32 %v1389_v56, 1.0  ;;  %v1581_v32 = vmin.f32 %v1391_v27, 1.0  ;;  %v1584_v57 = vmin.f32 %v1393_v11, 1.0 }
  0x7c   :  { %2447 = vst [vmem:[#allocation98_spill] sm:$0xff] %v1545_v15  ;;  %2448 = vst [vmem:[#allocation99_spill] sm:$0xff] %v1548_v24  ;;  %v1587_v59 = vmin.f32 %v1395_v2, 1.0  ;;  %v366_v61 = vsub.f32 %v2393_v34, %v1398_v40  ;;  %v367_v28 = vsub.f32 %v2395_v21, %v1401_v35  ;;  %v368_v58 = vsub.f32 %v2397_v22, %v1404_v55  ;;  %v2471_v40 = vld [vmem:[#allocation81_spill] sm:$0xff]  ;;  %v2483_v35 = vld [vmem:[#allocation88_spill] sm:$0xff] }
  0x7d   :  { %2449 = vst [vmem:[#allocation100_spill] sm:$0xff] %v1551_v44  ;;  %2450 = vst [vmem:[#allocation101_spill] sm:$0xff] %v1554_v16  ;;  %v369_v56 = vsub.f32 %v2399_v62, %v1407_v6  ;;  %v2486_v47 = vld [vmem:[#allocation89_spill] sm:$0xff]  ;;  %v2488_v38 = vld [vmem:[#allocation90_spill] sm:$0xff] }
  0x7e   :  { %2451 = vst [vmem:[#allocation102_spill] sm:$0xff] %v1557_v26  ;;  %2452 = vst [vmem:[#allocation103_spill] sm:$0xff] %v1560_v12  ;;  %v2492_v41 = vld [vmem:[#allocation91_spill] sm:$0xff]  ;;  %v2528_v22 = vld [vmem:[#allocation20_spill] sm:$0xff]  ;;  %v494_v11 = vmul.f32 2.0, %v366_v61  ;;  %v495_v2 = vmul.f32 2.0, %v367_v28  ;;  %v435_v61 = vmul.f32 %v1413_v48, %v1413_v48 }
  0x7f   :  { %2453 = vst [vmem:[#allocation104_spill] sm:$0xff] %v1563_v14  ;;  %2454 = vst [vmem:[#allocation105_spill] sm:$0xff] %v1566_v3  ;;  %v2527_v24 = vld [vmem:[#allocation15_spill] sm:$0xff]  ;;  %v431_v6 = vmul.f32 %v2528_v22, %v2528_v22  ;;  %v2529_v62 = vld [vmem:[#allocation25_spill] sm:$0xff]  ;;  %v497_v14 = vmul.f32 2.0, %v369_v56 }
  0x80   :  { %2455 = vst [vmem:[#allocation106_spill] sm:$0xff] %v1569_v25  ;;  %2456 = vst [vmem:[#allocation107_spill] sm:$0xff] %v1572_v43  ;;  %v2481_v43 = vld [vmem:[#allocation87_spill] sm:$0xff]  ;;  %v430_v55 = vmul.f32 %v2527_v24, %v2527_v24  ;;  %v432_v49 = vmul.f32 %v2529_v62, %v2529_v62  ;;  %v2530_v27 = vld [vmem:[#allocation29_spill] sm:$0xff] }
  0x81   :  { %2457 = vst [vmem:[#allocation108_spill] sm:$0xff] %v1575_v20  ;;  %2458 = vst [vmem:[#allocation109_spill] sm:$0xff] %v1578_v9  ;;  %v2465_v9 = vld [vmem:[#allocation78_spill] sm:$0xff]  ;;  %v433_v50 = vmul.f32 %v2530_v27, %v2530_v27  ;;  %v2539_v62 = vld [vmem:[#allocation75_spill] sm:$0xff] }
  0x82   :  { %2459 = vst [vmem:[#allocation110_spill] sm:$0xff] %v1581_v32  ;;  %2460 = vst [vmem:[#allocation111_spill] sm:$0xff] %v1584_v57  ;;  %v2478_v57 = vld [vmem:[#allocation85_spill] sm:$0xff]  ;;  %v434_v15 = vmul.f32 %v2539_v62, %v2539_v62  ;;  %v2540_v28 = vld [vmem:[#allocation34_spill] sm:$0xff]  ;;  %v438_v5 = vmul.f32 %v2465_v9, %v2465_v9 }
  0x83   :  { %2461 = vst [vmem:[#allocation112_spill] sm:$0xff] %v1587_v59  ;;  %v496_v59 = vmul.f32 2.0, %v368_v58  ;;  %v2541_v58 = vsub.f32 %v2540_v28, %v2539_v62  ;;  %v2542_v27 = vld [vmem:[#allocation38_spill] sm:$0xff]  ;;  %v2544_v20 = vld [vmem:[#allocation76_spill] sm:$0xff]  ;;  %v2545_v12 = vld [vmem:[#allocation77_spill] sm:$0xff]  ;;  %v558_v62 = vadd.f32 %v494_v11, %v430_v55  ;;  %v559_v28 = vadd.f32 %v495_v2, %v431_v6 }
  0x84   :  { %v2543_v3 = vsub.f32 %v2542_v27, %v1413_v48  ;;  %v436_v26 = vmul.f32 %v2544_v20, %v2544_v20  ;;  %v437_v44 = vmul.f32 %v2545_v12, %v2545_v12  ;;  %v2546_v16 = vld [vmem:[#allocation40_spill] sm:$0xff]  ;;  %v2548_v32 = vld [vmem:[#allocation42_spill] sm:$0xff]  ;;  %v561_v42 = vadd.f32 %v497_v14, %v433_v50  ;;  %v2554_v23 = vld [vmem:[#allocation79_spill] sm:$0xff] }
  0x85   :  { %v498_v56 = vmul.f32 2.0, %v2541_v58  ;;  %v2547_v22 = vsub.f32 %v2546_v16, %v2544_v20  ;;  %v2549_v21 = vsub.f32 %v2548_v32, %v2545_v12  ;;  %v560_v58 = vadd.f32 %v496_v59, %v432_v49  ;;  %v2555_v20 = vld [vmem:[#allocation44_spill] sm:$0xff]  ;;  %v2557_v11 = vld [vmem:[#allocation46_spill] sm:$0xff]  ;;  %v2562_v27 = vld [vmem:[#allocation51_spill] sm:$0xff] }
  0x86   :  { %v499_v25 = vmul.f32 2.0, %v2543_v3  ;;  %v439_v16 = vmul.f32 %v2554_v23, %v2554_v23  ;;  %v2556_v12 = vsub.f32 %v2555_v20, %v2465_v9  ;;  %v2558_v59 = vsub.f32 %v2557_v11, %v2554_v23  ;;  %v2559_v6 = vld [vmem:[#allocation80_spill] sm:$0xff] }
  0x87   :  { %v500_v24 = vmul.f32 2.0, %v2547_v22  ;;  %v501_v34 = vmul.f32 2.0, %v2549_v21  ;;  %v562_v2 = vadd.f32 %v498_v56, %v434_v15  ;;  %v440_v49 = vmul.f32 %v2559_v6, %v2559_v6  ;;  %v2560_v21 = vld [vmem:[#allocation49_spill] sm:$0xff]  ;;  %v2564_v15 = vld [vmem:[#allocation82_spill] sm:$0xff] }
  0x88   :  { %v502_v32 = vmul.f32 2.0, %v2556_v12  ;;  %v503_v14 = vmul.f32 2.0, %v2558_v59  ;;  %v563_v55 = vadd.f32 %v499_v25, %v435_v61  ;;  %v441_v50 = vmul.f32 %v2471_v40, %v2471_v40  ;;  %v2565_v61 = vld [vmem:[#allocation83_spill] sm:$0xff]  ;;  %v2566_v59 = vld [vmem:[#allocation53_spill] sm:$0xff] }
  0x89   :  { %v2550_v48 = vld [vmem:[#allocation111_spill] sm:$0xff]  ;;  %v2561_v22 = vsub.f32 %v2560_v21, %v2559_v6  ;;  %v2563_v9 = vsub.f32 %v2562_v27, %v2471_v40  ;;  %v564_v12 = vadd.f32 %v500_v24, %v436_v26  ;;  %v565_v63 = vadd.f32 %v501_v34, %v437_v44  ;;  %v2568_v6 = vld [vmem:[#allocation54_spill] sm:$0xff] }
  0x8a   :  { %v624_v23 = vadd.f32 %v560_v58, %v558_v62  ;;  %v655_v11 = vadd.f32 %v561_v42, %v559_v28  ;;  %v442_v25 = vmul.f32 %v2564_v15, %v2564_v15  ;;  %v443_v56 = vmul.f32 %v2565_v61, %v2565_v61  ;;  %v2570_v24 = vld [vmem:[#allocation55_spill] sm:$0xff]  ;;  %v2572_v58 = vld [vmem:[#allocation56_spill] sm:$0xff] }
  0x8b   :  { %v504_v45 = vmul.f32 2.0, %v2561_v22  ;;  %v505_v20 = vmul.f32 2.0, %v2563_v9  ;;  %v2567_v3 = vsub.f32 %v2566_v59, %v2564_v15  ;;  %v2569_v21 = vsub.f32 %v2568_v6, %v2565_v61 }
  0x8c   :  { %v566_v40 = vadd.f32 %v502_v32, %v438_v5  ;;  %v567_v27 = vadd.f32 %v503_v14, %v439_v16  ;;  %v625_v26 = vadd.f32 %v624_v23, %v562_v2  ;;  %v656_v44 = vadd.f32 %v655_v11, %v563_v55  ;;  %v2574_v32 = vld [vmem:[#allocation86_spill] sm:$0xff]  ;;  %v2575_v55 = vld [vmem:[#allocation57_spill] sm:$0xff] }
  0x8d   :  { %v506_v37 = vmul.f32 2.0, %v2567_v3  ;;  %v507_v22 = vmul.f32 2.0, %v2569_v21  ;;  %v444_v42 = vmul.f32 %v2476_v31, %v2476_v31  ;;  %v445_v34 = vmul.f32 %v2478_v57, %v2478_v57 }
  0x8e   :  { %v2571_v62 = vsub.f32 %v2570_v24, %v2476_v31  ;;  %v2573_v3 = vsub.f32 %v2572_v58, %v2478_v57  ;;  %v568_v15 = vadd.f32 %v504_v45, %v440_v49  ;;  %v569_v61 = vadd.f32 %v505_v20, %v441_v50  ;;  %v2577_v31 = vld [vmem:[#allocation58_spill] sm:$0xff]  ;;  %v2579_v20 = vld [vmem:[#allocation11_spill] sm:$0xff] }
  0x8f   :  { %v626_v5 = vadd.f32 %v625_v26, %v564_v12  ;;  %v657_v16 = vadd.f32 %v656_v44, %v565_v63  ;;  %v446_v14 = vmul.f32 %v2574_v32, %v2574_v32  ;;  %v447_v2 = vmul.f32 %v2481_v43, %v2481_v43  ;;  %v2581_v44 = vld [vmem:[#allocation18_spill] sm:$0xff] }
  0x90   :  { %v508_v28 = vmul.f32 2.0, %v2571_v62  ;;  %v509_v9 = vmul.f32 2.0, %v2573_v3  ;;  %v2576_v23 = vsub.f32 %v2575_v55, %v2574_v32  ;;  %v2578_v59 = vsub.f32 %v2577_v31, %v2481_v43 }
  0x91   :  { %v570_v57 = vadd.f32 %v506_v37, %v442_v25  ;;  %v571_v21 = vadd.f32 %v507_v22, %v443_v56  ;;  %v627_v45 = vadd.f32 %v626_v5, %v566_v40  ;;  %v658_v49 = vadd.f32 %v657_v16, %v567_v27  ;;  %v2583_v40 = vld [vmem:[#allocation12_spill] sm:$0xff] }
  0x92   :  { %v510_v11 = vmul.f32 2.0, %v2576_v23  ;;  %v511_v6 = vmul.f32 2.0, %v2578_v59  ;;  %v448_v63 = vmul.f32 %v2483_v35, %v2483_v35  ;;  %v449_v50 = vmul.f32 %v1455_v53, %v1455_v53 }
  0x93   :  { %v2580_v12 = vsub.f32 %v2579_v20, %v2483_v35  ;;  %v2582_v24 = vsub.f32 %v2581_v44, %v1455_v53  ;;  %v572_v43 = vadd.f32 %v508_v28, %v444_v42  ;;  %v573_v58 = vadd.f32 %v509_v9, %v445_v34  ;;  %v2585_v35 = vld [vmem:[#allocation19_spill] sm:$0xff] }
  0x94   :  { %v628_v37 = vadd.f32 %v627_v45, %v568_v15  ;;  %v659_v25 = vadd.f32 %v658_v49, %v569_v61  ;;  %v450_v56 = vmul.f32 %v2486_v47, %v2486_v47  ;;  %v451_v22 = vmul.f32 %v2488_v38, %v2488_v38  ;;  %v2587_v15 = vld [vmem:[#allocation22_spill] sm:$0xff] }
  0x95   :  { %v512_v26 = vmul.f32 2.0, %v2580_v12  ;;  %v513_v62 = vmul.f32 2.0, %v2582_v24  ;;  %v2584_v27 = vsub.f32 %v2583_v40, %v2486_v47  ;;  %v2586_v5 = vsub.f32 %v2585_v35, %v2488_v38  ;;  %v2589_v47 = vld [vmem:[#allocation13_spill] sm:$0xff]  ;;  %v2595_v24 = vld [vmem:[#allocation24_spill] sm:$0xff] }
  0x96   :  { %v574_v53 = vadd.f32 %v510_v11, %v446_v14  ;;  %v575_v32 = vadd.f32 %v511_v6, %v447_v2  ;;  %v629_v42 = vadd.f32 %v628_v37, %v570_v57  ;;  %v660_v34 = vadd.f32 %v659_v25, %v571_v21  ;;  %v2591_v57 = vld [vmem:[#allocation23_spill] sm:$0xff] }
  0x97   :  { %v514_v3 = vmul.f32 2.0, %v2584_v27  ;;  %v515_v16 = vmul.f32 2.0, %v2586_v5  ;;  %v452_v28 = vmul.f32 %v1464_v46, %v1464_v46  ;;  %v453_v9 = vmul.f32 %v1467_v36, %v1467_v36 }
  0x98   :  { %v2588_v61 = vsub.f32 %v2587_v15, %v1464_v46  ;;  %v2590_v23 = vsub.f32 %v2589_v47, %v1467_v36  ;;  %v576_v38 = vadd.f32 %v512_v26, %v448_v63  ;;  %v577_v59 = vadd.f32 %v513_v62, %v449_v50  ;;  %v2593_v46 = vld [vmem:[#allocation14_spill] sm:$0xff]  ;;  %v2603_v15 = vld [vmem:[#allocation28_spill] sm:$0xff] }
  0x99   :  { %v630_v14 = vadd.f32 %v629_v42, %v572_v43  ;;  %v661_v2 = vadd.f32 %v660_v34, %v573_v58  ;;  %v454_v11 = vmul.f32 %v2492_v41, %v2492_v41  ;;  %v455_v6 = vmul.f32 %v1473_v33, %v1473_v33 }
  0x9a   :  { %v516_v55 = vmul.f32 2.0, %v2588_v61  ;;  %v517_v31 = vmul.f32 2.0, %v2590_v23  ;;  %v2592_v21 = vsub.f32 %v2591_v57, %v2492_v41  ;;  %v2594_v49 = vsub.f32 %v2593_v46, %v1473_v33  ;;  %v2597_v41 = vld [vmem:[#allocation16_spill] sm:$0xff] }
  0x9b   :  { %v578_v36 = vadd.f32 %v514_v3, %v450_v56  ;;  %v579_v12 = vadd.f32 %v515_v16, %v451_v22  ;;  %v631_v63 = vadd.f32 %v630_v14, %v574_v53  ;;  %v662_v50 = vadd.f32 %v661_v2, %v575_v32  ;;  %v2599_v3 = vld [vmem:[#allocation27_spill] sm:$0xff] }
  0x9c   :  { %v518_v45 = vmul.f32 2.0, %v2592_v21  ;;  %v519_v20 = vmul.f32 2.0, %v2594_v49  ;;  %v456_v26 = vmul.f32 %v1476_v10, %v1476_v10  ;;  %v457_v44 = vmul.f32 %v1479_v30, %v1479_v30 }
  0x9d   :  { %v2596_v62 = vsub.f32 %v2595_v24, %v1476_v10  ;;  %v2598_v58 = vsub.f32 %v2597_v41, %v1479_v30  ;;  %v580_v33 = vadd.f32 %v516_v55, %v452_v28  ;;  %v581_v25 = vadd.f32 %v517_v31, %v453_v9  ;;  %v2601_v10 = vld [vmem:[#allocation17_spill] sm:$0xff] }
  0x9e   :  { %v632_v56 = vadd.f32 %v631_v63, %v576_v38  ;;  %v663_v22 = vadd.f32 %v662_v50, %v577_v59  ;;  %v458_v40 = vmul.f32 %v1482_v1, %v1482_v1  ;;  %v459_v27 = vmul.f32 %v1485_v0, %v1485_v0  ;;  %v2611_v63 = vld [vmem:[#allocation33_spill] sm:$0xff] }
  0x9f   :  { %v520_v43 = vmul.f32 2.0, %v2596_v62  ;;  %v521_v37 = vmul.f32 2.0, %v2598_v58  ;;  %v2600_v35 = vsub.f32 %v2599_v3, %v1482_v1  ;;  %v2602_v16 = vsub.f32 %v2601_v10, %v1485_v0  ;;  %v2605_v1 = vld [vmem:[#allocation31_spill] sm:$0xff] }
  0xa0   :  { %v582_v30 = vadd.f32 %v518_v45, %v454_v11  ;;  %v583_v32 = vadd.f32 %v519_v20, %v455_v6  ;;  %v633_v42 = vadd.f32 %v632_v56, %v578_v36  ;;  %v664_v34 = vadd.f32 %v663_v22, %v579_v12  ;;  %v2607_v11 = vld [vmem:[#allocation32_spill] sm:$0xff] }
  0xa1   :  { %v522_v5 = vmul.f32 2.0, %v2600_v35  ;;  %v523_v53 = vmul.f32 2.0, %v2602_v16  ;;  %v460_v28 = vmul.f32 %v1488_v13, %v1488_v13  ;;  %v461_v9 = vmul.f32 %v1491_v51, %v1491_v51  ;;  %v2619_v16 = vld [vmem:[#allocation37_spill] sm:$0xff] }
  0xa2   :  { %v2604_v61 = vsub.f32 %v2603_v15, %v1488_v13  ;;  %v2606_v47 = vsub.f32 %v2605_v1, %v1491_v51  ;;  %v584_v0 = vadd.f32 %v520_v43, %v456_v26  ;;  %v585_v31 = vadd.f32 %v521_v37, %v457_v44  ;;  %v2609_v13 = vld [vmem:[#allocation21_spill] sm:$0xff] }
  0xa3   :  { %v634_v38 = vadd.f32 %v633_v42, %v580_v33  ;;  %v665_v59 = vadd.f32 %v664_v34, %v581_v25  ;;  %v462_v14 = vmul.f32 %v1494_v4, %v1494_v4  ;;  %v463_v2 = vmul.f32 %v1497_v8, %v1497_v8  ;;  %v2615_v33 = vld [vmem:[#allocation36_spill] sm:$0xff] }
  0xa4   :  { %v524_v55 = vmul.f32 2.0, %v2604_v61  ;;  %v525_v23 = vmul.f32 2.0, %v2606_v47  ;;  %v2608_v6 = vsub.f32 %v2607_v11, %v1494_v4  ;;  %v2610_v21 = vsub.f32 %v2609_v13, %v1497_v8  ;;  %v2613_v4 = vld [vmem:[#allocation35_spill] sm:$0xff] }
  0xa5   :  { %v586_v51 = vadd.f32 %v522_v5, %v458_v40  ;;  %v587_v46 = vadd.f32 %v523_v53, %v459_v27  ;;  %v635_v49 = vadd.f32 %v634_v38, %v582_v30  ;;  %v666_v20 = vadd.f32 %v665_v59, %v583_v32 }
  0xa6   :  { %v526_v57 = vmul.f32 2.0, %v2608_v6  ;;  %v527_v45 = vmul.f32 2.0, %v2610_v21  ;;  %v464_v36 = vmul.f32 %v1500_v52, %v1500_v52  ;;  %v465_v12 = vmul.f32 %v1503_v54, %v1503_v54  ;;  %v2628_v6 = vld [vmem:[#allocation43_spill] sm:$0xff] }
  0xa7   :  { %v2612_v50 = vsub.f32 %v2611_v63, %v1500_v52  ;;  %v2614_v44 = vsub.f32 %v2613_v4, %v1503_v54  ;;  %v588_v8 = vadd.f32 %v524_v55, %v460_v28  ;;  %v589_v62 = vadd.f32 %v525_v23, %v461_v9  ;;  %v2617_v52 = vld [vmem:[#allocation26_spill] sm:$0xff]  ;;  %v2623_v55 = vld [vmem:[#allocation39_spill] sm:$0xff] }
  0xa8   :  { %v636_v43 = vadd.f32 %v635_v49, %v584_v0  ;;  %v667_v41 = vadd.f32 %v666_v20, %v585_v31  ;;  %v466_v58 = vmul.f32 %v1506_v29, %v1506_v29  ;;  %v467_v37 = vmul.f32 %v1509_v39, %v1509_v39  ;;  %v2632_v20 = vld [vmem:[#allocation93_spill] sm:$0xff] }
  0xa9   :  { %v528_v26 = vmul.f32 2.0, %v2612_v50  ;;  %v529_v24 = vmul.f32 2.0, %v2614_v44  ;;  %v2616_v25 = vsub.f32 %v2615_v33, %v1506_v29  ;;  %v2618_v22 = vsub.f32 %v2617_v52, %v1509_v39  ;;  %v2621_v29 = vld [vmem:[#allocation30_spill] sm:$0xff]  ;;  %v2634_v50 = vld [vmem:[#allocation59_spill] sm:$0xff]  ;;  %v2639_v33 = vld [vmem:[#allocation96_spill] sm:$0xff] }
  0xaa   :  { %v590_v54 = vadd.f32 %v526_v57, %v462_v14  ;;  %v591_v27 = vadd.f32 %v527_v45, %v463_v2  ;;  %v637_v3 = vadd.f32 %v636_v43, %v586_v51  ;;  %v668_v35 = vadd.f32 %v667_v41, %v587_v46  ;;  %v2627_v2 = vld [vmem:[#allocation92_spill] sm:$0xff] }
  0xab   :  { %v530_v56 = vmul.f32 2.0, %v2616_v25  ;;  %v531_v40 = vmul.f32 2.0, %v2618_v22  ;;  %v468_v5 = vmul.f32 %v1512_v7, %v1512_v7  ;;  %v469_v10 = vmul.f32 %v1515_v18, %v1515_v18 }
  0xac   :  { %v2620_v53 = vsub.f32 %v2619_v16, %v1512_v7  ;;  %v2622_v32 = vsub.f32 %v2621_v29, %v1515_v18  ;;  %v592_v39 = vadd.f32 %v528_v26, %v464_v36  ;;  %v593_v34 = vadd.f32 %v529_v24, %v465_v12  ;;  %v2625_v7 = vld [vmem:[#allocation41_spill] sm:$0xff]  ;;  %v2633_v12 = vld [vmem:[#allocation94_spill] sm:$0xff] }
  0xad   :  { %v638_v28 = vadd.f32 %v637_v3, %v588_v8  ;;  %v669_v9 = vadd.f32 %v668_v35, %v589_v62  ;;  %v470_v15 = vmul.f32 %v1518_v17, %v1518_v17  ;;  %v471_v61 = vmul.f32 %v1521_v60, %v1521_v60  ;;  %v2644_v16 = vld [vmem:[#allocation97_spill] sm:$0xff] }
  0xae   :  { %v532_v30 = vmul.f32 2.0, %v2620_v53  ;;  %v533_v42 = vmul.f32 2.0, %v2622_v32  ;;  %v2624_v1 = vsub.f32 %v2623_v55, %v1518_v17  ;;  %v2626_v23 = vsub.f32 %v2625_v7, %v1521_v60  ;;  %v2630_v17 = vld [vmem:[#allocation45_spill] sm:$0xff]  ;;  %v2646_v32 = vld [vmem:[#allocation62_spill] sm:$0xff] }
  0xaf   :  { %v594_v18 = vadd.f32 %v530_v56, %v466_v58  ;;  %v595_v31 = vadd.f32 %v531_v40, %v467_v37  ;;  %v639_v38 = vadd.f32 %v638_v28, %v590_v54  ;;  %v670_v59 = vadd.f32 %v669_v9, %v591_v27  ;;  %v2638_v58 = vld [vmem:[#allocation95_spill] sm:$0xff]  ;;  %v2640_v56 = vld [vmem:[#allocation48_spill] sm:$0xff]  ;;  %v2642_v40 = vld [vmem:[#allocation61_spill] sm:$0xff] }
  0xb0   :  { %v534_v47 = vmul.f32 2.0, %v2624_v1  ;;  %v535_v0 = vmul.f32 2.0, %v2626_v23  ;;  %v472_v14 = vmul.f32 %v1524_v19, %v1524_v19  ;;  %v473_v11 = vmul.f32 %v2627_v2, %v2627_v2  ;;  %v2651_v23 = vld [vmem:[#allocation100_spill] sm:$0xff] }
  0xb1   :  { %v2629_v57 = vsub.f32 %v2628_v6, %v1524_v19  ;;  %v2631_v21 = vsub.f32 %v2630_v17, %v2627_v2  ;;  %v596_v60 = vadd.f32 %v532_v30, %v468_v5  ;;  %v597_v51 = vadd.f32 %v533_v42, %v469_v10  ;;  %v2636_v19 = vld [vmem:[#allocation60_spill] sm:$0xff]  ;;  %v2645_v30 = vld [vmem:[#allocation98_spill] sm:$0xff]  ;;  %v2656_v17 = vld [vmem:[#allocation101_spill] sm:$0xff] }
  0xb2   :  { %v640_v46 = vadd.f32 %v639_v38, %v592_v39  ;;  %v671_v49 = vadd.f32 %v670_v59, %v593_v34  ;;  %v474_v36 = vmul.f32 %v2632_v20, %v2632_v20  ;;  %v475_v63 = vmul.f32 %v2633_v12, %v2633_v12  ;;  %v2648_v34 = vld [vmem:[#allocation50_spill] sm:$0xff]  ;;  %v2654_v59 = vld [vmem:[#allocation52_spill] sm:$0xff] }
  0xb3   :  { %v536_v13 = vmul.f32 2.0, %v2629_v57  ;;  %v537_v45 = vmul.f32 2.0, %v2631_v21  ;;  %v2635_v26 = vsub.f32 %v2634_v50, %v2632_v20  ;;  %v2637_v44 = vsub.f32 %v2636_v19, %v2633_v12  ;;  %v2660_v20 = vld [vmem:[#allocation64_spill] sm:$0xff]  ;;  %v2662_v19 = vld [vmem:[#allocation103_spill] sm:$0xff] }
  0xb4   :  { %v598_v8 = vadd.f32 %v534_v47, %v470_v15  ;;  %v599_v62 = vadd.f32 %v535_v0, %v471_v61  ;;  %v641_v43 = vadd.f32 %v640_v46, %v594_v18  ;;  %v672_v41 = vadd.f32 %v671_v49, %v595_v31  ;;  %v2650_v47 = vld [vmem:[#allocation99_spill] sm:$0xff] }
  0xb5   :  { %v538_v4 = vmul.f32 2.0, %v2635_v26  ;;  %v539_v24 = vmul.f32 2.0, %v2637_v44  ;;  %v476_v37 = vmul.f32 %v2638_v58, %v2638_v58  ;;  %v477_v25 = vmul.f32 %v2639_v33, %v2639_v33  ;;  %v2652_v18 = vld [vmem:[#allocation47_spill] sm:$0xff] }
  0xb6   :  { %v2641_v52 = vsub.f32 %v2640_v56, %v2638_v58  ;;  %v2643_v54 = vsub.f32 %v2642_v40, %v2639_v33  ;;  %v600_v3 = vadd.f32 %v536_v13, %v472_v14  ;;  %v601_v35 = vadd.f32 %v537_v45, %v473_v11  ;;  %v2657_v45 = vld [vmem:[#allocation102_spill] sm:$0xff]  ;;  %v2668_v40 = vld [vmem:[#allocation105_spill] sm:$0xff] }
  0xb7   :  { %v642_v5 = vadd.f32 %v641_v43, %v596_v60  ;;  %v673_v10 = vadd.f32 %v672_v41, %v597_v51  ;;  %v478_v53 = vmul.f32 %v2644_v16, %v2644_v16  ;;  %v479_v29 = vmul.f32 %v2645_v30, %v2645_v30  ;;  %v2658_v51 = vld [vmem:[#allocation63_spill] sm:$0xff]  ;;  %v2666_v58 = vld [vmem:[#allocation66_spill] sm:$0xff] }
  0xb8   :  { %v540_v22 = vmul.f32 2.0, %v2641_v52  ;;  %v541_v27 = vmul.f32 2.0, %v2643_v54  ;;  %v2647_v42 = vsub.f32 %v2646_v32, %v2644_v16  ;;  %v2649_v28 = vsub.f32 %v2648_v34, %v2645_v30  ;;  %v2672_v16 = vld [vmem:[#allocation68_spill] sm:$0xff]  ;;  %v2674_v34 = vld [vmem:[#allocation107_spill] sm:$0xff] }
  0xb9   :  { %v602_v15 = vadd.f32 %v538_v4, %v474_v36  ;;  %v603_v61 = vadd.f32 %v539_v24, %v475_v63  ;;  %v643_v55 = vadd.f32 %v642_v5, %v598_v8  ;;  %v674_v1 = vadd.f32 %v673_v10, %v599_v62  ;;  %v2663_v24 = vld [vmem:[#allocation104_spill] sm:$0xff]  ;;  %v2664_v62 = vld [vmem:[#allocation65_spill] sm:$0xff] }
  0xba   :  { %v542_v39 = vmul.f32 2.0, %v2647_v42  ;;  %v543_v9 = vmul.f32 2.0, %v2649_v28  ;;  %v480_v7 = vmul.f32 %v2650_v47, %v2650_v47  ;;  %v481_v0 = vmul.f32 %v2651_v23, %v2651_v23 }
  0xbb   :  { %v2653_v31 = vsub.f32 %v2652_v18, %v2650_v47  ;;  %v2655_v14 = vsub.f32 %v2654_v59, %v2651_v23  ;;  %v604_v11 = vadd.f32 %v540_v22, %v476_v37  ;;  %v605_v6 = vadd.f32 %v541_v27, %v477_v25  ;;  %v2669_v27 = vld [vmem:[#allocation106_spill] sm:$0xff]  ;;  %v2680_v59 = vld [vmem:[#allocation109_spill] sm:$0xff] }
  0xbc   :  { %v644_v57 = vadd.f32 %v643_v55, %v600_v3  ;;  %v675_v13 = vadd.f32 %v674_v1, %v601_v35  ;;  %v482_v21 = vmul.f32 %v2656_v17, %v2656_v17  ;;  %v483_v60 = vmul.f32 %v2657_v45, %v2657_v45  ;;  %v2670_v35 = vld [vmem:[#allocation67_spill] sm:$0xff]  ;;  %v2678_v47 = vld [vmem:[#allocation70_spill] sm:$0xff] }
  0xbd   :  { %v544_v38 = vmul.f32 2.0, %v2653_v31  ;;  %v545_v2 = vmul.f32 2.0, %v2655_v14  ;;  %v2659_v46 = vsub.f32 %v2658_v51, %v2656_v17  ;;  %v2661_v36 = vsub.f32 %v2660_v20, %v2657_v45  ;;  %v2684_v17 = vld [vmem:[#allocation72_spill] sm:$0xff] }
  0xbe   :  { %v606_v63 = vadd.f32 %v542_v39, %v478_v53  ;;  %v607_v50 = vadd.f32 %v543_v9, %v479_v29  ;;  %v645_v26 = vadd.f32 %v644_v57, %v602_v15  ;;  %v676_v4 = vadd.f32 %v675_v13, %v603_v61  ;;  %v2675_v9 = vld [vmem:[#allocation108_spill] sm:$0xff]  ;;  %v2676_v61 = vld [vmem:[#allocation69_spill] sm:$0xff] }
  0xbf   :  { %v546_v49 = vmul.f32 2.0, %v2659_v46  ;;  %v547_v12 = vmul.f32 2.0, %v2661_v36  ;;  %v484_v44 = vmul.f32 %v2662_v19, %v2662_v19  ;;  %v485_v8 = vmul.f32 %v2663_v24, %v2663_v24  ;;  %v2686_v36 = vld [vmem:[#allocation112_spill] sm:$0xff] }
  0xc0   :  { %v2665_v43 = vsub.f32 %v2664_v62, %v2662_v19  ;;  %v2667_v37 = vsub.f32 %v2666_v58, %v2663_v24  ;;  %v608_v25 = vadd.f32 %v544_v38, %v480_v7  ;;  %v609_v56 = vadd.f32 %v545_v2, %v481_v0  ;;  %v2681_v2 = vld [vmem:[#allocation110_spill] sm:$0xff] }
  0xc1   :  { %v646_v52 = vadd.f32 %v645_v26, %v604_v11  ;;  %v677_v22 = vadd.f32 %v676_v4, %v605_v6  ;;  %v486_v54 = vmul.f32 %v2668_v40, %v2668_v40  ;;  %v487_v3 = vmul.f32 %v2669_v27, %v2669_v27  ;;  %v2682_v6 = vld [vmem:[#allocation71_spill] sm:$0xff]  ;;  %v2689_v4 = vld [vmem:[#allocation74_spill] sm:$0xff] }
  0xc2   :  { %v548_v41 = vmul.f32 2.0, %v2665_v43  ;;  %v549_v33 = vmul.f32 2.0, %v2667_v37  ;;  %v2671_v5 = vsub.f32 %v2670_v35, %v2668_v40  ;;  %v2673_v53 = vsub.f32 %v2672_v16, %v2669_v27 }
  0xc3   :  { %v610_v29 = vadd.f32 %v546_v49, %v482_v21  ;;  %v611_v32 = vadd.f32 %v547_v12, %v483_v60  ;;  %v647_v42 = vadd.f32 %v646_v52, %v606_v63  ;;  %v678_v39 = vadd.f32 %v677_v22, %v607_v50  ;;  %v2687_v63 = vld [vmem:[#allocation73_spill] sm:$0xff] }
  0xc4   :  { %v550_v10 = vmul.f32 2.0, %v2671_v5  ;;  %v551_v30 = vmul.f32 2.0, %v2673_v53  ;;  %v488_v28 = vmul.f32 %v2674_v34, %v2674_v34  ;;  %v489_v15 = vmul.f32 %v2675_v9, %v2675_v9 }
  0xc5   :  { %v2677_v55 = vsub.f32 %v2676_v61, %v2674_v34  ;;  %v2679_v7 = vsub.f32 %v2678_v47, %v2675_v9  ;;  %v612_v0 = vadd.f32 %v548_v41, %v484_v44  ;;  %v613_v18 = vadd.f32 %v549_v33, %v485_v8 }
  0xc6   :  { %v648_v31 = vadd.f32 %v647_v42, %v608_v25  ;;  %v679_v38 = vadd.f32 %v678_v39, %v609_v56  ;;  %v490_v14 = vmul.f32 %v2680_v59, %v2680_v59  ;;  %v491_v11 = vmul.f32 %v2681_v2, %v2681_v2 }
  0xc7   :  { %v552_v1 = vmul.f32 2.0, %v2677_v55  ;;  %v553_v23 = vmul.f32 2.0, %v2679_v7  ;;  %v2683_v57 = vsub.f32 %v2682_v6, %v2680_v59  ;;  %v2685_v21 = vsub.f32 %v2684_v17, %v2681_v2 }
  0xc8   :  { %v614_v60 = vadd.f32 %v550_v10, %v486_v54  ;;  %v615_v51 = vadd.f32 %v551_v30, %v487_v3  ;;  %v649_v46 = vadd.f32 %v648_v31, %v610_v29  ;;  %v680_v49 = vadd.f32 %v679_v38, %v611_v32 }
  0xc9   :  { %v554_v13 = vmul.f32 2.0, %v2683_v57  ;;  %v555_v45 = vmul.f32 2.0, %v2685_v21  ;;  %v492_v20 = vmul.f32 %v2550_v48, %v2550_v48  ;;  %v493_v12 = vmul.f32 %v2686_v36, %v2686_v36 }
  0xca   :  { %v2688_v50 = vsub.f32 %v2687_v63, %v2550_v48  ;;  %v2690_v19 = vsub.f32 %v2689_v4, %v2686_v36  ;;  %v616_v24 = vadd.f32 %v552_v1, %v488_v28  ;;  %v617_v8 = vadd.f32 %v553_v23, %v489_v15 }
  0xcb   :  { %v650_v62 = vadd.f32 %v649_v46, %v612_v0  ;;  %v681_v43 = vadd.f32 %v680_v49, %v613_v18  ;;  %v618_v41 = vadd.f32 %v554_v13, %v490_v14  ;;  %v619_v58 = vadd.f32 %v555_v45, %v491_v11 }
  0xcc   :  { %v556_v26 = vmul.f32 2.0, %v2688_v50  ;;  %v557_v44 = vmul.f32 2.0, %v2690_v19 }
  0xcd   :  { %v651_v37 = vadd.f32 %v650_v62, %v614_v60  ;;  %v682_v33 = vadd.f32 %v681_v43, %v615_v51 }
  0xce   :  { %v620_v25 = vadd.f32 %v556_v26, %v492_v20  ;;  %v621_v56 = vadd.f32 %v557_v44, %v493_v12 }
  0xcf   :  { %v652_v52 = vadd.f32 %v651_v37, %v616_v24  ;;  %v683_v22 = vadd.f32 %v682_v33, %v617_v8 }
  0xd1   :  { %v653_v40 = vadd.f32 %v652_v52, %v618_v41  ;;  %v684_v54 = vadd.f32 %v683_v22, %v619_v58 }
  0xd3   :  { %v654_v48 = vadd.f32 %v653_v40, %v620_v25  ;;  %v685_v27 = vadd.f32 %v684_v54, %v621_v56 }
  0xd5   :  { %688 = vst [vmem:[#allocation7] sm:$0xff] %v654_v48  ;;  %689 = vst [vmem:[#allocation7 + $0x8] sm:$0xff] %v685_v27 }
  0xd6   :  { %763 = shalt.err (!%p760_p0)
}
  0xd7   :  { %699 = dma.vmem_to_hbm [thread:$0]  %s697_s1, 256, %s2030_s2, [#allocation4]  }
  0xd8   :  { %776 = dma.done.wait [#allocation4], 256  }
  0xd9   :  { %777 = vsyncadd [#allocation4], 4294967040 }
  0xda   :  { %703 = vsyncpa [#allocation3], 1 }
  0xdb   :  { %704 = vsyncpa [#allocation6], 1 }
  0xdc   :  { %705 = vsyncpa [#allocation4], 1 }

</bundles_post_ra>
